<compile_context>
chip_gen: v7x
topology: tpu7x:2x2x1
jax: 0.10.0
libtpu: 0.0.40
codegen_flags: <defaults>
</compile_context>

<pallas_src>
import functools

import jax
import jax.numpy as jnp
from jax.experimental import pallas as pl
from jax.experimental.pallas import tpu as pltpu


# ---------------------------------------------------------------------------
# Pallas kernel: sequential GRU recurrence over a block of t_blk timesteps.
# Gate order along the concatenated lane axis is [r, z, n] (PyTorch order).
#
#   gi_ref  : (t_blk, Bb, 3H)   precomputed X @ W_ih (no bias), maybe bf16
#   whh_ref : (H, 3H)           lane-concatenated hidden weights, maybe bf16
#   gib_ref : (1, 3H)           b_ih (all gates) + b_hh folded for r/z, f32
#   bhhn_ref: (1, H)            b_hh for the n gate (must stay inside r*(.))
#   out_ref : (t_blk, Bb, H)    f32
#   h_scr   : (Bb, H) f32 VMEM scratch, hidden state carried across time blocks
# ---------------------------------------------------------------------------
def _gru_rec_kernel(gi_ref, whh_ref, gib_ref, bhhn_ref, out_ref, h_scr,
                    *, t_blk, t_total, hidden):
    tb = pl.program_id(1)          # time-block index (sequential / "arbitrary")

    @pl.when(tb == 0)
    def _():
        # PyTorch nn.GRU with no h0 argument starts from zeros.
        h_scr[...] = jnp.zeros_like(h_scr)

    H = hidden
    whh = whh_ref[...]             # (H, 3H), resident across the whole grid
    gib = gib_ref[...]             # (1, 3H) f32
    bhh_n = bhhn_ref[...]          # (1, H)  f32

    def step(ti, h):
        # One fused recurrence matmul per timestep (review item #1).
        gh = jnp.dot(h.astype(whh.dtype), whh,
                     preferred_element_type=jnp.float32)            # (Bb, 3H)
        # Bias add in-kernel (review item: avoid an HBM pass for the bias).
        gi = gi_ref[ti].astype(jnp.float32) + gib                    # (Bb, 3H)
        r = jax.nn.sigmoid(gi[:, 0:H] + gh[:, 0:H])
        z = jax.nn.sigmoid(gi[:, H:2 * H] + gh[:, H:2 * H])
        n = jnp.tanh(gi[:, 2 * H:3 * H] + r * (gh[:, 2 * H:3 * H] + bhh_n))
        h_new = (1.0 - z) * n + z * h
        # Guard against the partial final time block (T not divisible by
        # t_blk): invalid steps must not advance the carried hidden state.
        valid = (tb * t_blk + ti) < t_total
        h_new = jnp.where(valid, h_new, h)
        out_ref[ti] = h_new.astype(out_ref.dtype)   # OOB rows discarded by Pallas
        return h_new

    # Hidden state stays in registers across the block; one VMEM store/block.
    h_scr[...] = jax.lax.fori_loop(0, t_blk, step, h_scr[...], unroll=True)


def _round_up(x, m):
    return ((x + m - 1) // m) * m


def _pick_t_block(T, Bb, H, gi_itemsize, stream_budget_bytes):
    """Largest time block whose double-buffered gi-in + out-blocks fit budget."""
    best = 1
    for cand in (2, 4, 8, 16, 32, 64):
        if cand > T:
            break
        need = 2 * cand * Bb * (3 * H) * gi_itemsize + 2 * cand * Bb * H * 4
        if need <= stream_budget_bytes:
            best = cand
        else:
            break
    return best


def gru_layer(x_tbe, w_ih, w_hh, b_ih, b_hh, *,
              matmul_dtype=jnp.float32,
              vmem_budget_bytes=48 * 1024 * 1024):
    """One GRU layer over a time-major sequence.

    x_tbe : (T, Bp, E) f32   (Bp a multiple of 8)
    w_ih  : (E, 3H) f32, gates concatenated [r|z|n] along the last axis
    w_hh  : (H, 3H) f32
    b_ih  : (3H,)   f32
    b_hh  : (3H,)   f32
    returns (T, Bp, H) f32
    """
    T, Bp, E = x_tbe.shape
    H = w_hh.shape[0]
    H3 = 3 * H
    f32 = jnp.float32
    highest = jax.lax.Precision.HIGHEST if matmul_dtype == jnp.float32 else None

    # ---- Hoisted input projection (off the serial path): one large,
    # lane-dense GEMM (T*Bp, E) @ (E, 3H) -> (T, Bp, 3H).  Stored in
    # matmul_dtype so bf16 mode also halves the HBM streaming of gi.
    gi = jnp.dot(x_tbe.reshape(T * Bp, E).astype(matmul_dtype),
                 w_ih.astype(matmul_dtype),
                 preferred_element_type=f32,
                 precision=highest).reshape(T, Bp, H3).astype(matmul_dtype)

    # Bias for the gi side: b_ih for all gates + b_hh folded for r/z gates.
    fold = jnp.concatenate([jnp.ones((2 * H,), f32), jnp.zeros((H,), f32)])
    gi_bias = (b_ih.astype(f32) + b_hh.astype(f32) * fold).reshape(1, H3)
    bhh_n = b_hh[2 * H:].astype(f32).reshape(1, H)   # stays inside r * (.)

    whh = w_hh.astype(matmul_dtype)

    # Batch-parallel grid axis (2nd TensorCore on v7x) when it stays a
    # multiple of 8 sublanes.  Rows of a GRU are independent.
    nb = 2 if (Bp >= 16 and Bp % 16 == 0) else 1
    Bb = Bp // nb

    gi_item = jnp.dtype(matmul_dtype).itemsize
    resident = (2 * (H * H3 * gi_item + H3 * 4 + H * 4)   # whh + biases (dbl-buffered)
                + Bb * H * 4)                             # h_scr
    t_blk = _pick_t_block(T, Bb, H, gi_item,
                          max(vmem_budget_bytes - resident, 1 << 20))
    nt = pl.cdiv(T, t_blk)

    stream = 2 * t_blk * Bb * H3 * gi_item + 2 * t_blk * Bb * H * 4
    vmem_limit = int(min(100 * 2**20, max(32 * 2**20, stream + resident + (8 << 20))))

    kernel = functools.partial(_gru_rec_kernel, t_blk=t_blk, t_total=T, hidden=H)
    return pl.pallas_call(
        kernel,
        out_shape=jax.ShapeDtypeStruct((T, Bp, H), f32),
        grid_spec=pltpu.PrefetchScalarGridSpec(
            num_scalar_prefetch=0,
            grid=(nb, nt),                                 # (batch ||, time seq)
            in_specs=[
                pl.BlockSpec((t_blk, Bb, H3), lambda bb, tb: (tb, bb, 0)),
                # TODO(synk): single-buffer these constant-index blocks with
                # pipeline_mode=pl.Buffered(1) once verified on the target
                # jax version (saves one resident W_hh copy in VMEM).
                pl.BlockSpec((H, H3), lambda bb, tb: (0, 0)),
                pl.BlockSpec((1, H3), lambda bb, tb: (0, 0)),
                pl.BlockSpec((1, H), lambda bb, tb: (0, 0)),
            ],
            out_specs=pl.BlockSpec((t_blk, Bb, H), lambda bb, tb: (tb, bb, 0)),
            scratch_shapes=[pltpu.VMEM((Bb, H), f32)],     # carried hidden state
        ),
        compiler_params=pltpu.CompilerParams(
            # Batch blocks are independent; the time axis MUST stay sequential
            # (h_scr carry).
            dimension_semantics=("parallel", "arbitrary"),
            vmem_limit_bytes=vmem_limit,
        ),
        # TODO(synk): if xprof shows gi HBM streaming bound (v5e/v6e), move the
        # input projection into the kernel (per-block (t_blk*Bb,E)@(E,3H)) to
        # kill the gi HBM round trip; optionally keep W_hh resident in the MXU
        # via pltpu.matmul_push_rhs / matmul_acc_lhs / matmul_pop.
    )(gi, whh, gi_bias, bhh_n)


# ---------------------------------------------------------------------------
# Parameter construction (deterministic, PyTorch-like uniform init).
# Weights stored gate-concatenated: w_ih (in, 3H), w_hh (H, 3H), biases (3H,),
# gate order [r, z, n] along the last (lane) axis.
# ---------------------------------------------------------------------------
def init_encoder_params(key, vocab_size, embedding_dim, hidden_dim, n_layers):
    keys = jax.random.split(key, 1 + 4 * n_layers)
    params = {"embedding": jax.random.normal(keys[0], (vocab_size, embedding_dim),
                                             jnp.float32)}
    bound = 1.0 / float(hidden_dim) ** 0.5
    layers = []
    for l in range(n_layers):
        in_dim = embedding_dim if l == 0 else hidden_dim
        k0, k1, k2, k3 = keys[1 + 4 * l: 5 + 4 * l]
        layers.append({
            "w_ih": jax.random.uniform(k0, (in_dim, 3 * hidden_dim), jnp.float32,
                                       -bound, bound),
            "w_hh": jax.random.uniform(k1, (hidden_dim, 3 * hidden_dim), jnp.float32,
                                       -bound, bound),
            "b_ih": jax.random.uniform(k2, (3 * hidden_dim,), jnp.float32,
                                       -bound, bound),
            "b_hh": jax.random.uniform(k3, (3 * hidden_dim,), jnp.float32,
                                       -bound, bound),
        })
    params["layers"] = layers
    return params


# ---------------------------------------------------------------------------
# Encoder forward (matches nn.Module.forward in eval mode).
# ---------------------------------------------------------------------------
def encoder_forward(params, tokens, *, matmul_dtype=jnp.float32):
    """tokens: (B, T) int32 -> (outputs (B, T, H), hidden (n_layers, B, H))."""
    B, T = tokens.shape
    # Embedding gathered directly time-major (no extra HBM transpose pass).
    emb = jnp.take(params["embedding"], tokens.T, axis=0)          # (T, B, E)
    # TODO(synk): nn.Dropout (on the embedding and between GRU layers) is
    # identity in eval mode; train-time dropout is not modeled.

    # Pad batch to a multiple of 8 sublanes so all (B, H) tiles are unmasked;
    # padded rows are independent and sliced away at the end.
    Bp = _round_up(B, 8)
    x = jnp.pad(emb, ((0, 0), (0, Bp - B), (0, 0))) if Bp != B else emb

    hiddens = []
    for lyr in params["layers"]:
        x = gru_layer(x, lyr["w_ih"], lyr["w_hh"], lyr["b_ih"], lyr["b_hh"],
                      matmul_dtype=matmul_dtype)
        hiddens.append(x[-1, :B])                                  # final h
    outputs = jnp.transpose(x[:, :B], (1, 0, 2))                   # (B, T, H)
    hidden = jnp.stack(hiddens, axis=0)                            # (n_layers, B, H)
    return outputs, hidden


# ---------------------------------------------------------------------------
# Pure-JAX reference (lax.scan) for a correctness check.
# ---------------------------------------------------------------------------
def _gru_layer_ref(x_tbe, w_ih, w_hh, b_ih, b_hh):
    H = w_hh.shape[0]
    hp = jax.lax.Precision.HIGHEST

    def step(h, x_t):
        gi = jnp.dot(x_t, w_ih, precision=hp) + b_ih               # (B, 3H)
        gh = jnp.dot(h, w_hh, precision=hp) + b_hh                 # (B, 3H)
        r = jax.nn.sigmoid(gi[:, 0:H] + gh[:, 0:H])
        z = jax.nn.sigmoid(gi[:, H:2 * H] + gh[:, H:2 * H])
        n = jnp.tanh(gi[:, 2 * H:] + r * gh[:, 2 * H:])
        h_new = (1.0 - z) * n + z * h
        return h_new, h_new

    h0 = jnp.zeros((x_tbe.shape[1], H), jnp.float32)
    _, ys = jax.lax.scan(step, h0, x_tbe)
    return ys


def encoder_forward_ref(params, tokens):
    emb = jnp.take(params["embedding"], tokens.T, axis=0)
    x = emb
    hiddens = []
    for lyr in params["layers"]:
        x = _gru_layer_ref(x, lyr["w_ih"], lyr["w_hh"], lyr["b_ih"], lyr["b_hh"])
        hiddens.append(x[-1])
    return jnp.transpose(x, (1, 0, 2)), jnp.stack(hiddens, axis=0)


if __name__ == "__main__":
    # Small shapes; hidden_dim=128 keeps the gate slices lane-aligned, and
    # T=12 exercises the partial-final-time-block guard (t_blk=8, cdiv grid).
    vocab_size, embedding_dim, hidden_dim, n_layers, dropout = 64, 32, 128, 2, 0.1
    B, T = 2, 12

    key = jax.random.PRNGKey(0)
    pkey, tkey = jax.random.split(key)
    params = init_encoder_params(pkey, vocab_size, embedding_dim, hidden_dim, n_layers)
    tokens = jax.random.randint(tkey, (B, T), 0, vocab_size, dtype=jnp.int32)

    # f32 path (exact): check against the pure-JAX reference.
    fwd = jax.jit(functools.partial(encoder_forward, matmul_dtype=jnp.float32))
    outputs, hidden = jax.block_until_ready(fwd(params, tokens))
    out_ref, hid_ref = jax.block_until_ready(encoder_forward_ref(params, tokens))

    assert outputs.shape == (B, T, hidden_dim)
    assert hidden.shape == (n_layers, B, hidden_dim)
    assert jnp.allclose(outputs, out_ref, atol=1e-4, rtol=1e-4)
    assert jnp.allclose(hidden, hid_ref, atol=1e-4, rtol=1e-4)

    # bf16 matmul-operand production path (f32 accumulate / gate math):
    # looser tolerance, as noted in the review.
    fwd_bf16 = jax.jit(functools.partial(encoder_forward, matmul_dtype=jnp.bfloat16))
    out_b, hid_b = jax.block_until_ready(fwd_bf16(params, tokens))
    assert out_b.shape == (B, T, hidden_dim)
    assert float(jnp.max(jnp.abs(out_b - out_ref))) < 0.1

    print("KERNEL_OK")
</pallas_src>

<mosaic_0001>
module attributes {stable_mosaic.version = 11 : i64} {
  func.func @_gru_rec_kernel(%arg0: i32, %arg1: i32, %arg2: memref<8x8x384xf32, #tpu.memory_space<vmem>>, %arg3: memref<128x384xf32, #tpu.memory_space<vmem>>, %arg4: memref<1x384xf32, #tpu.memory_space<vmem>>, %arg5: memref<1x128xf32, #tpu.memory_space<vmem>>, %arg6: memref<8x8x128xf32, #tpu.memory_space<vmem>>, %arg7: memref<8x128xf32, #tpu.memory_space<vmem>>) attributes {dimension_semantics = [#tpu.dimension_semantics<parallel>, #tpu.dimension_semantics<arbitrary>], iteration_bounds = array<i64: 1, 2>, scalar_prefetch = 0 : i64, scratch_operands = 1 : i64, tpu.core_type = #tpu.core_type<tc>, window_params = [{transform_indices = @transform_0, window_bounds = array<i64: 8, 8, 384>}, {pipeline_mode = #tpu.pipeline_mode<synchronous>, transform_indices = @transform_1, window_bounds = array<i64: 128, 384>}, {pipeline_mode = #tpu.pipeline_mode<synchronous>, transform_indices = @transform_2, window_bounds = array<i64: 1, 384>}, {pipeline_mode = #tpu.pipeline_mode<synchronous>, transform_indices = @transform_3, window_bounds = array<i64: 1, 128>}, {transform_indices = @transform_4, window_bounds = array<i64: 8, 8, 128>}]} {
    %c0_i32 = arith.constant 0 : i32
    %0 = arith.cmpi eq, %arg1, %c0_i32 : i32
    %1 = arith.extui %0 : i1 to i32
    %c0_i32_0 = arith.constant 0 : i32
    %2 = arith.cmpi ne, %1, %c0_i32_0 : i32
    scf.if %2 {
      %cst_89 = arith.constant 0.000000e+00 : f32
      %344 = vector.broadcast %cst_89 : f32 to vector<8x128xf32>
      %c0_90 = arith.constant 0 : index
      %c0_91 = arith.constant 0 : index
      %345 = vector.load %arg7[%c0_90, %c0_91] : memref<8x128xf32, #tpu.memory_space<vmem>>, vector<8x128xf32>
      tpu.vector_store %arg7[%c0_90, %c0_91], %344 {strides = array<i32>} : memref<8x128xf32, #tpu.memory_space<vmem>>, vector<8x128xf32>,
    } else {
    }
    %c0 = arith.constant 0 : index
    %c0_1 = arith.constant 0 : index
    %3 = vector.load %arg3[%c0, %c0_1] : memref<128x384xf32, #tpu.memory_space<vmem>>, vector<128x384xf32>
    %c0_2 = arith.constant 0 : index
    %c0_3 = arith.constant 0 : index
    %4 = vector.load %arg4[%c0_2, %c0_3] : memref<1x384xf32, #tpu.memory_space<vmem>>, vector<1x384xf32>
    %c0_4 = arith.constant 0 : index
    %c0_5 = arith.constant 0 : index
    %5 = vector.load %arg5[%c0_4, %c0_5] : memref<1x128xf32, #tpu.memory_space<vmem>>, vector<1x128xf32>
    %c0_6 = arith.constant 0 : index
    %c0_7 = arith.constant 0 : index
    %6 = vector.load %arg7[%c0_6, %c0_7] : memref<8x128xf32, #tpu.memory_space<vmem>>, vector<8x128xf32>
    %c0_i32_8 = arith.constant 0 : i32
    %cst = arith.constant dense<0.000000e+00> : vector<8x384xf32>
    %7 = tpu.matmul %6, %3, %cst {dimension_numbers = #tpu.dot_dimension_numbers<[1], [0], [0], [1], [0, 0, 1, 1], [], []>} : vector<8x128xf32>, vector<128x384xf32>, vector<8x384xf32> -> vector<8x384xf32>
    %8 = arith.index_cast %c0_i32_8 : i32 to index
    %c0_9 = arith.constant 0 : index
    %c0_10 = arith.constant 0 : index
    %9 = vector.load %arg2[%8, %c0_9, %c0_10] : memref<8x8x384xf32, #tpu.memory_space<vmem>>, vector<1x8x384xf32>
    %10 = vector.shape_cast %9 : vector<1x8x384xf32> to vector<8x384xf32>
    %11 = vector.broadcast %4 : vector<1x384xf32> to vector<8x384xf32>
    %12 = arith.addf %10, %11 : vector<8x384xf32>
    %13 = vector.extract_strided_slice %12 {offsets = [0, 0], sizes = [8, 128], strides = [1, 1]} : vector<8x384xf32> to vector<8x128xf32>
    %14 = vector.extract_strided_slice %7 {offsets = [0, 0], sizes = [8, 128], strides = [1, 1]} : vector<8x384xf32> to vector<8x128xf32>
    %15 = arith.addf %13, %14 : vector<8x128xf32>
    %16 = arith.negf %15 : vector<8x128xf32>
    %17 = math.exp %16 : vector<8x128xf32>
    %cst_11 = arith.constant 1.000000e+00 : f32
    %18 = vector.broadcast %cst_11 : f32 to vector<8x128xf32>
    %19 = arith.addf %18, %17 : vector<8x128xf32>
    %20 = arith.divf %18, %19 : vector<8x128xf32>
    %21 = vector.extract_strided_slice %12 {offsets = [0, 128], sizes = [8, 128], strides = [1, 1]} : vector<8x384xf32> to vector<8x128xf32>
    %22 = vector.extract_strided_slice %7 {offsets = [0, 128], sizes = [8, 128], strides = [1, 1]} : vector<8x384xf32> to vector<8x128xf32>
    %23 = arith.addf %21, %22 : vector<8x128xf32>
    %24 = arith.negf %23 : vector<8x128xf32>
    %25 = math.exp %24 : vector<8x128xf32>
    %cst_12 = arith.constant 1.000000e+00 : f32
    %26 = vector.broadcast %cst_12 : f32 to vector<8x128xf32>
    %27 = arith.addf %26, %25 : vector<8x128xf32>
    %28 = arith.divf %26, %27 : vector<8x128xf32>
    %29 = vector.extract_strided_slice %12 {offsets = [0, 256], sizes = [8, 128], strides = [1, 1]} : vector<8x384xf32> to vector<8x128xf32>
    %30 = vector.extract_strided_slice %7 {offsets = [0, 256], sizes = [8, 128], strides = [1, 1]} : vector<8x384xf32> to vector<8x128xf32>
    %31 = vector.broadcast %5 : vector<1x128xf32> to vector<8x128xf32>
    %32 = arith.addf %30, %31 : vector<8x128xf32>
    %33 = arith.mulf %20, %32 : vector<8x128xf32>
    %34 = arith.addf %29, %33 : vector<8x128xf32>
    %35 = math.tanh %34 : vector<8x128xf32>
    %cst_13 = arith.constant 1.000000e+00 : f32
    %36 = vector.broadcast %cst_13 : f32 to vector<8x128xf32>
    %37 = arith.subf %36, %28 : vector<8x128xf32>
    %38 = arith.mulf %37, %35 : vector<8x128xf32>
    %39 = arith.mulf %28, %6 : vector<8x128xf32>
    %40 = arith.addf %38, %39 : vector<8x128xf32>
    %c8_i32 = arith.constant 8 : i32
    %41 = arith.muli %arg1, %c8_i32 : i32
    %42 = arith.addi %41, %c0_i32_8 : i32
    %c12_i32 = arith.constant 12 : i32
    %43 = arith.cmpi slt, %42, %c12_i32 : i32
    %44 = arith.select %43, %40, %6 : vector<8x128xf32>
    %45 = arith.index_cast %c0_i32_8 : i32 to index
    %c0_14 = arith.constant 0 : index
    %c0_15 = arith.constant 0 : index
    %46 = vector.load %arg6[%45, %c0_14, %c0_15] : memref<8x8x128xf32, #tpu.memory_space<vmem>>, vector<1x8x128xf32>
    %47 = vector.shape_cast %46 : vector<1x8x128xf32> to vector<8x128xf32>
    %48 = vector.shape_cast %44 : vector<8x128xf32> to vector<1x8x128xf32>
    tpu.vector_store %arg6[%45, %c0_14, %c0_15], %48 {strides = array<i32>} : memref<8x8x128xf32, #tpu.memory_space<vmem>>, vector<1x8x128xf32>,
    %c1_i32 = arith.constant 1 : i32
    %cst_16 = arith.constant dense<0.000000e+00> : vector<8x384xf32>
    %49 = tpu.matmul %44, %3, %cst_16 {dimension_numbers = #tpu.dot_dimension_numbers<[1], [0], [0], [1], [0, 0, 1, 1], [], []>} : vector<8x128xf32>, vector<128x384xf32>, vector<8x384xf32> -> vector<8x384xf32>
    %50 = arith.index_cast %c1_i32 : i32 to index
    %c0_17 = arith.constant 0 : index
    %c0_18 = arith.constant 0 : index
    %51 = vector.load %arg2[%50, %c0_17, %c0_18] : memref<8x8x384xf32, #tpu.memory_space<vmem>>, vector<1x8x384xf32>
    %52 = vector.shape_cast %51 : vector<1x8x384xf32> to vector<8x384xf32>
    %53 = vector.broadcast %4 : vector<1x384xf32> to vector<8x384xf32>
    %54 = arith.addf %52, %53 : vector<8x384xf32>
    %55 = vector.extract_strided_slice %54 {offsets = [0, 0], sizes = [8, 128], strides = [1, 1]} : vector<8x384xf32> to vector<8x128xf32>
    %56 = vector.extract_strided_slice %49 {offsets = [0, 0], sizes = [8, 128], strides = [1, 1]} : vector<8x384xf32> to vector<8x128xf32>
    %57 = arith.addf %55, %56 : vector<8x128xf32>
    %58 = arith.negf %57 : vector<8x128xf32>
    %59 = math.exp %58 : vector<8x128xf32>
    %cst_19 = arith.constant 1.000000e+00 : f32
    %60 = vector.broadcast %cst_19 : f32 to vector<8x128xf32>
    %61 = arith.addf %60, %59 : vector<8x128xf32>
    %62 = arith.divf %60, %61 : vector<8x128xf32>
    %63 = vector.extract_strided_slice %54 {offsets = [0, 128], sizes = [8, 128], strides = [1, 1]} : vector<8x384xf32> to vector<8x128xf32>
    %64 = vector.extract_strided_slice %49 {offsets = [0, 128], sizes = [8, 128], strides = [1, 1]} : vector<8x384xf32> to vector<8x128xf32>
    %65 = arith.addf %63, %64 : vector<8x128xf32>
    %66 = arith.negf %65 : vector<8x128xf32>
    %67 = math.exp %66 : vector<8x128xf32>
    %cst_20 = arith.constant 1.000000e+00 : f32
    %68 = vector.broadcast %cst_20 : f32 to vector<8x128xf32>
    %69 = arith.addf %68, %67 : vector<8x128xf32>
    %70 = arith.divf %68, %69 : vector<8x128xf32>
    %71 = vector.extract_strided_slice %54 {offsets = [0, 256], sizes = [8, 128], strides = [1, 1]} : vector<8x384xf32> to vector<8x128xf32>
    %72 = vector.extract_strided_slice %49 {offsets = [0, 256], sizes = [8, 128], strides = [1, 1]} : vector<8x384xf32> to vector<8x128xf32>
    %73 = vector.broadcast %5 : vector<1x128xf32> to vector<8x128xf32>
    %74 = arith.addf %72, %73 : vector<8x128xf32>
    %75 = arith.mulf %62, %74 : vector<8x128xf32>
    %76 = arith.addf %71, %75 : vector<8x128xf32>
    %77 = math.tanh %76 : vector<8x128xf32>
    %cst_21 = arith.constant 1.000000e+00 : f32
    %78 = vector.broadcast %cst_21 : f32 to vector<8x128xf32>
    %79 = arith.subf %78, %70 : vector<8x128xf32>
    %80 = arith.mulf %79, %77 : vector<8x128xf32>
    %81 = arith.mulf %70, %44 : vector<8x128xf32>
    %82 = arith.addf %80, %81 : vector<8x128xf32>
    %c8_i32_22 = arith.constant 8 : i32
    %83 = arith.muli %arg1, %c8_i32_22 : i32
    %84 = arith.addi %83, %c1_i32 : i32
    %c12_i32_23 = arith.constant 12 : i32
    %85 = arith.cmpi slt, %84, %c12_i32_23 : i32
    %86 = arith.select %85, %82, %44 : vector<8x128xf32>
    %87 = arith.index_cast %c1_i32 : i32 to index
    %c0_24 = arith.constant 0 : index
    %c0_25 = arith.constant 0 : index
    %88 = vector.load %arg6[%87, %c0_24, %c0_25] : memref<8x8x128xf32, #tpu.memory_space<vmem>>, vector<1x8x128xf32>
    %89 = vector.shape_cast %88 : vector<1x8x128xf32> to vector<8x128xf32>
    %90 = vector.shape_cast %86 : vector<8x128xf32> to vector<1x8x128xf32>
    tpu.vector_store %arg6[%87, %c0_24, %c0_25], %90 {strides = array<i32>} : memref<8x8x128xf32, #tpu.memory_space<vmem>>, vector<1x8x128xf32>,
    %c2_i32 = arith.constant 2 : i32
    %cst_26 = arith.constant dense<0.000000e+00> : vector<8x384xf32>
    %91 = tpu.matmul %86, %3, %cst_26 {dimension_numbers = #tpu.dot_dimension_numbers<[1], [0], [0], [1], [0, 0, 1, 1], [], []>} : vector<8x128xf32>, vector<128x384xf32>, vector<8x384xf32> -> vector<8x384xf32>
    %92 = arith.index_cast %c2_i32 : i32 to index
    %c0_27 = arith.constant 0 : index
    %c0_28 = arith.constant 0 : index
    %93 = vector.load %arg2[%92, %c0_27, %c0_28] : memref<8x8x384xf32, #tpu.memory_space<vmem>>, vector<1x8x384xf32>
    %94 = vector.shape_cast %93 : vector<1x8x384xf32> to vector<8x384xf32>
    %95 = vector.broadcast %4 : vector<1x384xf32> to vector<8x384xf32>
    %96 = arith.addf %94, %95 : vector<8x384xf32>
    %97 = vector.extract_strided_slice %96 {offsets = [0, 0], sizes = [8, 128], strides = [1, 1]} : vector<8x384xf32> to vector<8x128xf32>
    %98 = vector.extract_strided_slice %91 {offsets = [0, 0], sizes = [8, 128], strides = [1, 1]} : vector<8x384xf32> to vector<8x128xf32>
    %99 = arith.addf %97, %98 : vector<8x128xf32>
    %100 = arith.negf %99 : vector<8x128xf32>
    %101 = math.exp %100 : vector<8x128xf32>
    %cst_29 = arith.constant 1.000000e+00 : f32
    %102 = vector.broadcast %cst_29 : f32 to vector<8x128xf32>
    %103 = arith.addf %102, %101 : vector<8x128xf32>
    %104 = arith.divf %102, %103 : vector<8x128xf32>
    %105 = vector.extract_strided_slice %96 {offsets = [0, 128], sizes = [8, 128], strides = [1, 1]} : vector<8x384xf32> to vector<8x128xf32>
    %106 = vector.extract_strided_slice %91 {offsets = [0, 128], sizes = [8, 128], strides = [1, 1]} : vector<8x384xf32> to vector<8x128xf32>
    %107 = arith.addf %105, %106 : vector<8x128xf32>
    %108 = arith.negf %107 : vector<8x128xf32>
    %109 = math.exp %108 : vector<8x128xf32>
    %cst_30 = arith.constant 1.000000e+00 : f32
    %110 = vector.broadcast %cst_30 : f32 to vector<8x128xf32>
    %111 = arith.addf %110, %109 : vector<8x128xf32>
    %112 = arith.divf %110, %111 : vector<8x128xf32>
    %113 = vector.extract_strided_slice %96 {offsets = [0, 256], sizes = [8, 128], strides = [1, 1]} : vector<8x384xf32> to vector<8x128xf32>
    %114 = vector.extract_strided_slice %91 {offsets = [0, 256], sizes = [8, 128], strides = [1, 1]} : vector<8x384xf32> to vector<8x128xf32>
    %115 = vector.broadcast %5 : vector<1x128xf32> to vector<8x128xf32>
    %116 = arith.addf %114, %115 : vector<8x128xf32>
    %117 = arith.mulf %104, %116 : vector<8x128xf32>
    %118 = arith.addf %113, %117 : vector<8x128xf32>
    %119 = math.tanh %118 : vector<8x128xf32>
    %cst_31 = arith.constant 1.000000e+00 : f32
    %120 = vector.broadcast %cst_31 : f32 to vector<8x128xf32>
    %121 = arith.subf %120, %112 : vector<8x128xf32>
    %122 = arith.mulf %121, %119 : vector<8x128xf32>
    %123 = arith.mulf %112, %86 : vector<8x128xf32>
    %124 = arith.addf %122, %123 : vector<8x128xf32>
    %c8_i32_32 = arith.constant 8 : i32
    %125 = arith.muli %arg1, %c8_i32_32 : i32
    %126 = arith.addi %125, %c2_i32 : i32
    %c12_i32_33 = arith.constant 12 : i32
    %127 = arith.cmpi slt, %126, %c12_i32_33 : i32
    %128 = arith.select %127, %124, %86 : vector<8x128xf32>
    %129 = arith.index_cast %c2_i32 : i32 to index
    %c0_34 = arith.constant 0 : index
    %c0_35 = arith.constant 0 : index
    %130 = vector.load %arg6[%129, %c0_34, %c0_35] : memref<8x8x128xf32, #tpu.memory_space<vmem>>, vector<1x8x128xf32>
    %131 = vector.shape_cast %130 : vector<1x8x128xf32> to vector<8x128xf32>
    %132 = vector.shape_cast %128 : vector<8x128xf32> to vector<1x8x128xf32>
    tpu.vector_store %arg6[%129, %c0_34, %c0_35], %132 {strides = array<i32>} : memref<8x8x128xf32, #tpu.memory_space<vmem>>, vector<1x8x128xf32>,
    %c3_i32 = arith.constant 3 : i32
    %cst_36 = arith.constant dense<0.000000e+00> : vector<8x384xf32>
    %133 = tpu.matmul %128, %3, %cst_36 {dimension_numbers = #tpu.dot_dimension_numbers<[1], [0], [0], [1], [0, 0, 1, 1], [], []>} : vector<8x128xf32>, vector<128x384xf32>, vector<8x384xf32> -> vector<8x384xf32>
    %134 = arith.index_cast %c3_i32 : i32 to index
    %c0_37 = arith.constant 0 : index
    %c0_38 = arith.constant 0 : index
    %135 = vector.load %arg2[%134, %c0_37, %c0_38] : memref<8x8x384xf32, #tpu.memory_space<vmem>>, vector<1x8x384xf32>
    %136 = vector.shape_cast %135 : vector<1x8x384xf32> to vector<8x384xf32>
    %137 = vector.broadcast %4 : vector<1x384xf32> to vector<8x384xf32>
    %138 = arith.addf %136, %137 : vector<8x384xf32>
    %139 = vector.extract_strided_slice %138 {offsets = [0, 0], sizes = [8, 128], strides = [1, 1]} : vector<8x384xf32> to vector<8x128xf32>
    %140 = vector.extract_strided_slice %133 {offsets = [0, 0], sizes = [8, 128], strides = [1, 1]} : vector<8x384xf32> to vector<8x128xf32>
    %141 = arith.addf %139, %140 : vector<8x128xf32>
    %142 = arith.negf %141 : vector<8x128xf32>
    %143 = math.exp %142 : vector<8x128xf32>
    %cst_39 = arith.constant 1.000000e+00 : f32
    %144 = vector.broadcast %cst_39 : f32 to vector<8x128xf32>
    %145 = arith.addf %144, %143 : vector<8x128xf32>
    %146 = arith.divf %144, %145 : vector<8x128xf32>
    %147 = vector.extract_strided_slice %138 {offsets = [0, 128], sizes = [8, 128], strides = [1, 1]} : vector<8x384xf32> to vector<8x128xf32>
    %148 = vector.extract_strided_slice %133 {offsets = [0, 128], sizes = [8, 128], strides = [1, 1]} : vector<8x384xf32> to vector<8x128xf32>
    %149 = arith.addf %147, %148 : vector<8x128xf32>
    %150 = arith.negf %149 : vector<8x128xf32>
    %151 = math.exp %150 : vector<8x128xf32>
    %cst_40 = arith.constant 1.000000e+00 : f32
    %152 = vector.broadcast %cst_40 : f32 to vector<8x128xf32>
    %153 = arith.addf %152, %151 : vector<8x128xf32>
    %154 = arith.divf %152, %153 : vector<8x128xf32>
    %155 = vector.extract_strided_slice %138 {offsets = [0, 256], sizes = [8, 128], strides = [1, 1]} : vector<8x384xf32> to vector<8x128xf32>
    %156 = vector.extract_strided_slice %133 {offsets = [0, 256], sizes = [8, 128], strides = [1, 1]} : vector<8x384xf32> to vector<8x128xf32>
    %157 = vector.broadcast %5 : vector<1x128xf32> to vector<8x128xf32>
    %158 = arith.addf %156, %157 : vector<8x128xf32>
    %159 = arith.mulf %146, %158 : vector<8x128xf32>
    %160 = arith.addf %155, %159 : vector<8x128xf32>
    %161 = math.tanh %160 : vector<8x128xf32>
    %cst_41 = arith.constant 1.000000e+00 : f32
    %162 = vector.broadcast %cst_41 : f32 to vector<8x128xf32>
    %163 = arith.subf %162, %154 : vector<8x128xf32>
    %164 = arith.mulf %163, %161 : vector<8x128xf32>
    %165 = arith.mulf %154, %128 : vector<8x128xf32>
    %166 = arith.addf %164, %165 : vector<8x128xf32>
    %c8_i32_42 = arith.constant 8 : i32
    %167 = arith.muli %arg1, %c8_i32_42 : i32
    %168 = arith.addi %167, %c3_i32 : i32
    %c12_i32_43 = arith.constant 12 : i32
    %169 = arith.cmpi slt, %168, %c12_i32_43 : i32
    %170 = arith.select %169, %166, %128 : vector<8x128xf32>
    %171 = arith.index_cast %c3_i32 : i32 to index
    %c0_44 = arith.constant 0 : index
    %c0_45 = arith.constant 0 : index
    %172 = vector.load %arg6[%171, %c0_44, %c0_45] : memref<8x8x128xf32, #tpu.memory_space<vmem>>, vector<1x8x128xf32>
    %173 = vector.shape_cast %172 : vector<1x8x128xf32> to vector<8x128xf32>
    %174 = vector.shape_cast %170 : vector<8x128xf32> to vector<1x8x128xf32>
    tpu.vector_store %arg6[%171, %c0_44, %c0_45], %174 {strides = array<i32>} : memref<8x8x128xf32, #tpu.memory_space<vmem>>, vector<1x8x128xf32>,
    %c4_i32 = arith.constant 4 : i32
    %cst_46 = arith.constant dense<0.000000e+00> : vector<8x384xf32>
    %175 = tpu.matmul %170, %3, %cst_46 {dimension_numbers = #tpu.dot_dimension_numbers<[1], [0], [0], [1], [0, 0, 1, 1], [], []>} : vector<8x128xf32>, vector<128x384xf32>, vector<8x384xf32> -> vector<8x384xf32>
    %176 = arith.index_cast %c4_i32 : i32 to index
    %c0_47 = arith.constant 0 : index
    %c0_48 = arith.constant 0 : index
    %177 = vector.load %arg2[%176, %c0_47, %c0_48] : memref<8x8x384xf32, #tpu.memory_space<vmem>>, vector<1x8x384xf32>
    %178 = vector.shape_cast %177 : vector<1x8x384xf32> to vector<8x384xf32>
    %179 = vector.broadcast %4 : vector<1x384xf32> to vector<8x384xf32>
    %180 = arith.addf %178, %179 : vector<8x384xf32>
    %181 = vector.extract_strided_slice %180 {offsets = [0, 0], sizes = [8, 128], strides = [1, 1]} : vector<8x384xf32> to vector<8x128xf32>
    %182 = vector.extract_strided_slice %175 {offsets = [0, 0], sizes = [8, 128], strides = [1, 1]} : vector<8x384xf32> to vector<8x128xf32>
    %183 = arith.addf %181, %182 : vector<8x128xf32>
    %184 = arith.negf %183 : vector<8x128xf32>
    %185 = math.exp %184 : vector<8x128xf32>
    %cst_49 = arith.constant 1.000000e+00 : f32
    %186 = vector.broadcast %cst_49 : f32 to vector<8x128xf32>
    %187 = arith.addf %186, %185 : vector<8x128xf32>
    %188 = arith.divf %186, %187 : vector<8x128xf32>
    %189 = vector.extract_strided_slice %180 {offsets = [0, 128], sizes = [8, 128], strides = [1, 1]} : vector<8x384xf32> to vector<8x128xf32>
    %190 = vector.extract_strided_slice %175 {offsets = [0, 128], sizes = [8, 128], strides = [1, 1]} : vector<8x384xf32> to vector<8x128xf32>
    %191 = arith.addf %189, %190 : vector<8x128xf32>
    %192 = arith.negf %191 : vector<8x128xf32>
    %193 = math.exp %192 : vector<8x128xf32>
    %cst_50 = arith.constant 1.000000e+00 : f32
    %194 = vector.broadcast %cst_50 : f32 to vector<8x128xf32>
    %195 = arith.addf %194, %193 : vector<8x128xf32>
    %196 = arith.divf %194, %195 : vector<8x128xf32>
    %197 = vector.extract_strided_slice %180 {offsets = [0, 256], sizes = [8, 128], strides = [1, 1]} : vector<8x384xf32> to vector<8x128xf32>
    %198 = vector.extract_strided_slice %175 {offsets = [0, 256], sizes = [8, 128], strides = [1, 1]} : vector<8x384xf32> to vector<8x128xf32>
    %199 = vector.broadcast %5 : vector<1x128xf32> to vector<8x128xf32>
    %200 = arith.addf %198, %199 : vector<8x128xf32>
    %201 = arith.mulf %188, %200 : vector<8x128xf32>
    %202 = arith.addf %197, %201 : vector<8x128xf32>
    %203 = math.tanh %202 : vector<8x128xf32>
    %cst_51 = arith.constant 1.000000e+00 : f32
    %204 = vector.broadcast %cst_51 : f32 to vector<8x128xf32>
    %205 = arith.subf %204, %196 : vector<8x128xf32>
    %206 = arith.mulf %205, %203 : vector<8x128xf32>
    %207 = arith.mulf %196, %170 : vector<8x128xf32>
    %208 = arith.addf %206, %207 : vector<8x128xf32>
    %c8_i32_52 = arith.constant 8 : i32
    %209 = arith.muli %arg1, %c8_i32_52 : i32
    %210 = arith.addi %209, %c4_i32 : i32
    %c12_i32_53 = arith.constant 12 : i32
    %211 = arith.cmpi slt, %210, %c12_i32_53 : i32
    %212 = arith.select %211, %208, %170 : vector<8x128xf32>
    %213 = arith.index_cast %c4_i32 : i32 to index
    %c0_54 = arith.constant 0 : index
    %c0_55 = arith.constant 0 : index
    %214 = vector.load %arg6[%213, %c0_54, %c0_55] : memref<8x8x128xf32, #tpu.memory_space<vmem>>, vector<1x8x128xf32>
    %215 = vector.shape_cast %214 : vector<1x8x128xf32> to vector<8x128xf32>
    %216 = vector.shape_cast %212 : vector<8x128xf32> to vector<1x8x128xf32>
    tpu.vector_store %arg6[%213, %c0_54, %c0_55], %216 {strides = array<i32>} : memref<8x8x128xf32, #tpu.memory_space<vmem>>, vector<1x8x128xf32>,
    %c5_i32 = arith.constant 5 : i32
    %cst_56 = arith.constant dense<0.000000e+00> : vector<8x384xf32>
    %217 = tpu.matmul %212, %3, %cst_56 {dimension_numbers = #tpu.dot_dimension_numbers<[1], [0], [0], [1], [0, 0, 1, 1], [], []>} : vector<8x128xf32>, vector<128x384xf32>, vector<8x384xf32> -> vector<8x384xf32>
    %218 = arith.index_cast %c5_i32 : i32 to index
    %c0_57 = arith.constant 0 : index
    %c0_58 = arith.constant 0 : index
    %219 = vector.load %arg2[%218, %c0_57, %c0_58] : memref<8x8x384xf32, #tpu.memory_space<vmem>>, vector<1x8x384xf32>
    %220 = vector.shape_cast %219 : vector<1x8x384xf32> to vector<8x384xf32>
    %221 = vector.broadcast %4 : vector<1x384xf32> to vector<8x384xf32>
    %222 = arith.addf %220, %221 : vector<8x384xf32>
    %223 = vector.extract_strided_slice %222 {offsets = [0, 0], sizes = [8, 128], strides = [1, 1]} : vector<8x384xf32> to vector<8x128xf32>
    %224 = vector.extract_strided_slice %217 {offsets = [0, 0], sizes = [8, 128], strides = [1, 1]} : vector<8x384xf32> to vector<8x128xf32>
    %225 = arith.addf %223, %224 : vector<8x128xf32>
    %226 = arith.negf %225 : vector<8x128xf32>
    %227 = math.exp %226 : vector<8x128xf32>
    %cst_59 = arith.constant 1.000000e+00 : f32
    %228 = vector.broadcast %cst_59 : f32 to vector<8x128xf32>
    %229 = arith.addf %228, %227 : vector<8x128xf32>
    %230 = arith.divf %228, %229 : vector<8x128xf32>
    %231 = vector.extract_strided_slice %222 {offsets = [0, 128], sizes = [8, 128], strides = [1, 1]} : vector<8x384xf32> to vector<8x128xf32>
    %232 = vector.extract_strided_slice %217 {offsets = [0, 128], sizes = [8, 128], strides = [1, 1]} : vector<8x384xf32> to vector<8x128xf32>
    %233 = arith.addf %231, %232 : vector<8x128xf32>
    %234 = arith.negf %233 : vector<8x128xf32>
    %235 = math.exp %234 : vector<8x128xf32>
    %cst_60 = arith.constant 1.000000e+00 : f32
    %236 = vector.broadcast %cst_60 : f32 to vector<8x128xf32>
    %237 = arith.addf %236, %235 : vector<8x128xf32>
    %238 = arith.divf %236, %237 : vector<8x128xf32>
    %239 = vector.extract_strided_slice %222 {offsets = [0, 256], sizes = [8, 128], strides = [1, 1]} : vector<8x384xf32> to vector<8x128xf32>
    %240 = vector.extract_strided_slice %217 {offsets = [0, 256], sizes = [8, 128], strides = [1, 1]} : vector<8x384xf32> to vector<8x128xf32>
    %241 = vector.broadcast %5 : vector<1x128xf32> to vector<8x128xf32>
    %242 = arith.addf %240, %241 : vector<8x128xf32>
    %243 = arith.mulf %230, %242 : vector<8x128xf32>
    %244 = arith.addf %239, %243 : vector<8x128xf32>
    %245 = math.tanh %244 : vector<8x128xf32>
    %cst_61 = arith.constant 1.000000e+00 : f32
    %246 = vector.broadcast %cst_61 : f32 to vector<8x128xf32>
    %247 = arith.subf %246, %238 : vector<8x128xf32>
    %248 = arith.mulf %247, %245 : vector<8x128xf32>
    %249 = arith.mulf %238, %212 : vector<8x128xf32>
    %250 = arith.addf %248, %249 : vector<8x128xf32>
    %c8_i32_62 = arith.constant 8 : i32
    %251 = arith.muli %arg1, %c8_i32_62 : i32
    %252 = arith.addi %251, %c5_i32 : i32
    %c12_i32_63 = arith.constant 12 : i32
    %253 = arith.cmpi slt, %252, %c12_i32_63 : i32
    %254 = arith.select %253, %250, %212 : vector<8x128xf32>
    %255 = arith.index_cast %c5_i32 : i32 to index
    %c0_64 = arith.constant 0 : index
    %c0_65 = arith.constant 0 : index
    %256 = vector.load %arg6[%255, %c0_64, %c0_65] : memref<8x8x128xf32, #tpu.memory_space<vmem>>, vector<1x8x128xf32>
    %257 = vector.shape_cast %256 : vector<1x8x128xf32> to vector<8x128xf32>
    %258 = vector.shape_cast %254 : vector<8x128xf32> to vector<1x8x128xf32>
    tpu.vector_store %arg6[%255, %c0_64, %c0_65], %258 {strides = array<i32>} : memref<8x8x128xf32, #tpu.memory_space<vmem>>, vector<1x8x128xf32>,
    %c6_i32 = arith.constant 6 : i32
    %cst_66 = arith.constant dense<0.000000e+00> : vector<8x384xf32>
    %259 = tpu.matmul %254, %3, %cst_66 {dimension_numbers = #tpu.dot_dimension_numbers<[1], [0], [0], [1], [0, 0, 1, 1], [], []>} : vector<8x128xf32>, vector<128x384xf32>, vector<8x384xf32> -> vector<8x384xf32>
    %260 = arith.index_cast %c6_i32 : i32 to index
    %c0_67 = arith.constant 0 : index
    %c0_68 = arith.constant 0 : index
    %261 = vector.load %arg2[%260, %c0_67, %c0_68] : memref<8x8x384xf32, #tpu.memory_space<vmem>>, vector<1x8x384xf32>
    %262 = vector.shape_cast %261 : vector<1x8x384xf32> to vector<8x384xf32>
    %263 = vector.broadcast %4 : vector<1x384xf32> to vector<8x384xf32>
    %264 = arith.addf %262, %263 : vector<8x384xf32>
    %265 = vector.extract_strided_slice %264 {offsets = [0, 0], sizes = [8, 128], strides = [1, 1]} : vector<8x384xf32> to vector<8x128xf32>
    %266 = vector.extract_strided_slice %259 {offsets = [0, 0], sizes = [8, 128], strides = [1, 1]} : vector<8x384xf32> to vector<8x128xf32>
    %267 = arith.addf %265, %266 : vector<8x128xf32>
    %268 = arith.negf %267 : vector<8x128xf32>
    %269 = math.exp %268 : vector<8x128xf32>
    %cst_69 = arith.constant 1.000000e+00 : f32
    %270 = vector.broadcast %cst_69 : f32 to vector<8x128xf32>
    %271 = arith.addf %270, %269 : vector<8x128xf32>
    %272 = arith.divf %270, %271 : vector<8x128xf32>
    %273 = vector.extract_strided_slice %264 {offsets = [0, 128], sizes = [8, 128], strides = [1, 1]} : vector<8x384xf32> to vector<8x128xf32>
    %274 = vector.extract_strided_slice %259 {offsets = [0, 128], sizes = [8, 128], strides = [1, 1]} : vector<8x384xf32> to vector<8x128xf32>
    %275 = arith.addf %273, %274 : vector<8x128xf32>
    %276 = arith.negf %275 : vector<8x128xf32>
    %277 = math.exp %276 : vector<8x128xf32>
    %cst_70 = arith.constant 1.000000e+00 : f32
    %278 = vector.broadcast %cst_70 : f32 to vector<8x128xf32>
    %279 = arith.addf %278, %277 : vector<8x128xf32>
    %280 = arith.divf %278, %279 : vector<8x128xf32>
    %281 = vector.extract_strided_slice %264 {offsets = [0, 256], sizes = [8, 128], strides = [1, 1]} : vector<8x384xf32> to vector<8x128xf32>
    %282 = vector.extract_strided_slice %259 {offsets = [0, 256], sizes = [8, 128], strides = [1, 1]} : vector<8x384xf32> to vector<8x128xf32>
    %283 = vector.broadcast %5 : vector<1x128xf32> to vector<8x128xf32>
    %284 = arith.addf %282, %283 : vector<8x128xf32>
    %285 = arith.mulf %272, %284 : vector<8x128xf32>
    %286 = arith.addf %281, %285 : vector<8x128xf32>
    %287 = math.tanh %286 : vector<8x128xf32>
    %cst_71 = arith.constant 1.000000e+00 : f32
    %288 = vector.broadcast %cst_71 : f32 to vector<8x128xf32>
    %289 = arith.subf %288, %280 : vector<8x128xf32>
    %290 = arith.mulf %289, %287 : vector<8x128xf32>
    %291 = arith.mulf %280, %254 : vector<8x128xf32>
    %292 = arith.addf %290, %291 : vector<8x128xf32>
    %c8_i32_72 = arith.constant 8 : i32
    %293 = arith.muli %arg1, %c8_i32_72 : i32
    %294 = arith.addi %293, %c6_i32 : i32
    %c12_i32_73 = arith.constant 12 : i32
    %295 = arith.cmpi slt, %294, %c12_i32_73 : i32
    %296 = arith.select %295, %292, %254 : vector<8x128xf32>
    %297 = arith.index_cast %c6_i32 : i32 to index
    %c0_74 = arith.constant 0 : index
    %c0_75 = arith.constant 0 : index
    %298 = vector.load %arg6[%297, %c0_74, %c0_75] : memref<8x8x128xf32, #tpu.memory_space<vmem>>, vector<1x8x128xf32>
    %299 = vector.shape_cast %298 : vector<1x8x128xf32> to vector<8x128xf32>
    %300 = vector.shape_cast %296 : vector<8x128xf32> to vector<1x8x128xf32>
    tpu.vector_store %arg6[%297, %c0_74, %c0_75], %300 {strides = array<i32>} : memref<8x8x128xf32, #tpu.memory_space<vmem>>, vector<1x8x128xf32>,
    %c7_i32 = arith.constant 7 : i32
    %cst_76 = arith.constant dense<0.000000e+00> : vector<8x384xf32>
    %301 = tpu.matmul %296, %3, %cst_76 {dimension_numbers = #tpu.dot_dimension_numbers<[1], [0], [0], [1], [0, 0, 1, 1], [], []>} : vector<8x128xf32>, vector<128x384xf32>, vector<8x384xf32> -> vector<8x384xf32>
    %302 = arith.index_cast %c7_i32 : i32 to index
    %c0_77 = arith.constant 0 : index
    %c0_78 = arith.constant 0 : index
    %303 = vector.load %arg2[%302, %c0_77, %c0_78] : memref<8x8x384xf32, #tpu.memory_space<vmem>>, vector<1x8x384xf32>
    %304 = vector.shape_cast %303 : vector<1x8x384xf32> to vector<8x384xf32>
    %305 = vector.broadcast %4 : vector<1x384xf32> to vector<8x384xf32>
    %306 = arith.addf %304, %305 : vector<8x384xf32>
    %307 = vector.extract_strided_slice %306 {offsets = [0, 0], sizes = [8, 128], strides = [1, 1]} : vector<8x384xf32> to vector<8x128xf32>
    %308 = vector.extract_strided_slice %301 {offsets = [0, 0], sizes = [8, 128], strides = [1, 1]} : vector<8x384xf32> to vector<8x128xf32>
    %309 = arith.addf %307, %308 : vector<8x128xf32>
    %310 = arith.negf %309 : vector<8x128xf32>
    %311 = math.exp %310 : vector<8x128xf32>
    %cst_79 = arith.constant 1.000000e+00 : f32
    %312 = vector.broadcast %cst_79 : f32 to vector<8x128xf32>
    %313 = arith.addf %312, %311 : vector<8x128xf32>
    %314 = arith.divf %312, %313 : vector<8x128xf32>
    %315 = vector.extract_strided_slice %306 {offsets = [0, 128], sizes = [8, 128], strides = [1, 1]} : vector<8x384xf32> to vector<8x128xf32>
    %316 = vector.extract_strided_slice %301 {offsets = [0, 128], sizes = [8, 128], strides = [1, 1]} : vector<8x384xf32> to vector<8x128xf32>
    %317 = arith.addf %315, %316 : vector<8x128xf32>
    %318 = arith.negf %317 : vector<8x128xf32>
    %319 = math.exp %318 : vector<8x128xf32>
    %cst_80 = arith.constant 1.000000e+00 : f32
    %320 = vector.broadcast %cst_80 : f32 to vector<8x128xf32>
    %321 = arith.addf %320, %319 : vector<8x128xf32>
    %322 = arith.divf %320, %321 : vector<8x128xf32>
    %323 = vector.extract_strided_slice %306 {offsets = [0, 256], sizes = [8, 128], strides = [1, 1]} : vector<8x384xf32> to vector<8x128xf32>
    %324 = vector.extract_strided_slice %301 {offsets = [0, 256], sizes = [8, 128], strides = [1, 1]} : vector<8x384xf32> to vector<8x128xf32>
    %325 = vector.broadcast %5 : vector<1x128xf32> to vector<8x128xf32>
    %326 = arith.addf %324, %325 : vector<8x128xf32>
    %327 = arith.mulf %314, %326 : vector<8x128xf32>
    %328 = arith.addf %323, %327 : vector<8x128xf32>
    %329 = math.tanh %328 : vector<8x128xf32>
    %cst_81 = arith.constant 1.000000e+00 : f32
    %330 = vector.broadcast %cst_81 : f32 to vector<8x128xf32>
    %331 = arith.subf %330, %322 : vector<8x128xf32>
    %332 = arith.mulf %331, %329 : vector<8x128xf32>
    %333 = arith.mulf %322, %296 : vector<8x128xf32>
    %334 = arith.addf %332, %333 : vector<8x128xf32>
    %c8_i32_82 = arith.constant 8 : i32
    %335 = arith.muli %arg1, %c8_i32_82 : i32
    %336 = arith.addi %335, %c7_i32 : i32
    %c12_i32_83 = arith.constant 12 : i32
    %337 = arith.cmpi slt, %336, %c12_i32_83 : i32
    %338 = arith.select %337, %334, %296 : vector<8x128xf32>
    %339 = arith.index_cast %c7_i32 : i32 to index
    %c0_84 = arith.constant 0 : index
    %c0_85 = arith.constant 0 : index
    %340 = vector.load %arg6[%339, %c0_84, %c0_85] : memref<8x8x128xf32, #tpu.memory_space<vmem>>, vector<1x8x128xf32>
    %341 = vector.shape_cast %340 : vector<1x8x128xf32> to vector<8x128xf32>
    %342 = vector.shape_cast %338 : vector<8x128xf32> to vector<1x8x128xf32>
    tpu.vector_store %arg6[%339, %c0_84, %c0_85], %342 {strides = array<i32>} : memref<8x8x128xf32, #tpu.memory_space<vmem>>, vector<1x8x128xf32>,
    %c8_i32_86 = arith.constant 8 : i32
    %c0_87 = arith.constant 0 : index
    %c0_88 = arith.constant 0 : index
    %343 = vector.load %arg7[%c0_87, %c0_88] : memref<8x128xf32, #tpu.memory_space<vmem>>, vector<8x128xf32>
    tpu.vector_store %arg7[%c0_87, %c0_88], %338 {strides = array<i32>} : memref<8x128xf32, #tpu.memory_space<vmem>>, vector<8x128xf32>,
    return
  }
  func.func @transform_0(%arg0: i32, %arg1: i32) -> (i32, i32, i32) {
    %c0_i32 = arith.constant 0 : i32
    %c0_i32_0 = arith.constant 0 : i32
    return %arg1, %arg0, %c0_i32 : i32, i32, i32
  }
  func.func @transform_1(%arg0: i32, %arg1: i32) -> (i32, i32) {
    %c0_i32 = arith.constant 0 : i32
    %c0_i32_0 = arith.constant 0 : i32
    %c0_i32_1 = arith.constant 0 : i32
    return %c0_i32, %c0_i32_0 : i32, i32
  }
  func.func @transform_2(%arg0: i32, %arg1: i32) -> (i32, i32) {
    %c0_i32 = arith.constant 0 : i32
    %c0_i32_0 = arith.constant 0 : i32
    %c0_i32_1 = arith.constant 0 : i32
    return %c0_i32, %c0_i32_0 : i32, i32
  }
  func.func @transform_3(%arg0: i32, %arg1: i32) -> (i32, i32) {
    %c0_i32 = arith.constant 0 : i32
    %c0_i32_0 = arith.constant 0 : i32
    %c0_i32_1 = arith.constant 0 : i32
    return %c0_i32, %c0_i32_0 : i32, i32
  }
  func.func @transform_4(%arg0: i32, %arg1: i32) -> (i32, i32, i32) {
    %c0_i32 = arith.constant 0 : i32
    %c0_i32_0 = arith.constant 0 : i32
    return %arg1, %arg0, %c0_i32 : i32, i32, i32
  }
}

</mosaic_0001>

<bundles_post_ra>
// kernel: encoder_forward.2
= control target key start
LH: loop header
LB: loop body
LE: loop exit
PB: predicated region body
PF: predicated region fallthrough
CT: control target
= control target key end

     0   :  { %s3280_s15 = smov 0   ;;  %s3282_s16 = smov 0   ;;  %s4005_s0 = inlined_call_operand.vmem [shape: f32[12,8,384], index: 0, kind: input, shape index: {}]   ;;  %s4006_s1 = inlined_call_operand.vmem [shape: f32[128,384], index: 1, kind: input, shape index: {}]   ;;  %s4007_s2 = inlined_call_operand.vmem [shape: f32[1,384], index: 2, kind: input, shape index: {}]   ;;  %s4008_s3 = inlined_call_operand.vmem [shape: f32[1,128], index: 3, kind: input, shape index: {}]   ;;  %s4009_s4 = inlined_call_operand.vmem [shape: f32[12,8,128], index: 4, kind: output, shape index: {}]  }
   0x1   :  { %s3284_s17 = smov 0   ;;  %s3286_s18 = smov 0  }
   0x2   :  { %s3288_s19 = smov 0  }
   0x3 LB: > { %s2019_s20 = sadd.s32 4294967295, %s3217_s19   ;;  %s23_s21 = sadd.s32 1, %s3213_s18  ;;  %s3217_s19 = sphi %s3288_s19, %s14_s19   ;;  %s3213_s18 = sphi %s3286_s18, %s4017_s18   ;;  %s3209_s17 = sphi %s3284_s17, %s4016_s17   ;;  %s3205_s16 = sphi %s3282_s16, %s4015_s16   ;;  %s3201_s15 = sphi %s3280_s15, %s4014_s15  }
   0x4   : > { %p24_p0 = scmp.ge.s32.totalorder %s23_s21, 2  ;;  %s126_s22 = sadd.s32 1, %s3205_s16 }
   0x5   : > { %p136_p1 = scmp.ne.s32.totalorder %s3205_s16, %s3201_s15  ;;  %p137_p2 = scmp.eq.s32.totalorder %s2019_s20, 1 }
   0x6   : > { %s4019_s21 = smov (%p24_p0, %s23_s21), 0  ;;  %p2023_p4 = scmp.ge.s32.totalorder %s3217_s19, 1 }
   0x7   : > { %p3309_p3 = por %p137_p2, %p136_p1  ;;  %s121_s24 = ssub.s32 %s3213_s18, %s4019_s21 }
   0x8   : > { %p194_p5 = scmp.lt.s32.totalorder %s3217_s19, 3  ;;  %p124_p6 = scmp.eq.s32.totalorder %s121_s24, 0 }
   0xa   : > { %p195_p7 = pnand %p2023_p4, %p194_p5 }
   0xb   : > { %s3318_s25 = scalar_select %p124_p6, %s3205_s16, %s126_s22  }
   0xc   : > { %198 = sbr.rel (%p195_p7) target bundleno = 2192 (0x890), region = 36  ;;  %s226_s26 = sand.u32 (!%p195_p7), 1, %s3201_s15  }
   0xd   : > { %s3321_s27 = sshll.u32 (!%p195_p7), %s3209_s17, 3  ;;  %s2024_s28 = sshll.u32 (!%p195_p7), %s226_s26, 6 }
   0xe   : > { %p235_p8 = scmp.lt.s32.totalorder (!%p195_p7), %s3321_s27, 11  ;;  %s3330_s8 = scalar_lea.vmem (!%p195_p7), [#allocation3], %s2024_s28  }
   0xf   : > { %p2027_p9 = scmp.ne.s32.totalorder (!%p195_p7), %s3209_s17, 0 }
  0x13   : > { %s236_s29 = scalar_select %p235_p8, %s3321_s27, 11 }
  0x14   : > { %258 = sbr.rel (%p2027_p9) target bundleno = 27 (0x1b), region = 40  ;;  %v3251_v0 = vmov (!%p2027_p9), 0.0  }
  0x15   : > { %s2958_s30 = smul.u32 24, %s236_s29  ;;  %259 = vst [vmem:[#allocation2] sm:$0xff] (!%p2027_p9), %v3251_v0 }
  0x17   : > { %s3328_s7 = scalar_lea.vmem %s4005_s0, %s2958_s30 }
  0x1b PF: > { %v261_v1 = vld [vmem:[%s4006_s1 + $0x8] sm:$0xff]  ;;  %v264_v2 = vld [vmem:[%s4006_s1 + $0x20] sm:$0xff]  ;;  %v263_v5 = vld [vmem:[%s4006_s1 + $0x18] sm:$0xff]  ;;  %v3252_v8 = vmov 0.0|0.0   ;;  %v3253_v9 = vmov 0.0   ;;  %vm3254_vm0 = vmmov 0  }
  0x1c   : > { %v260_v3 = vld [vmem:[%s4006_s1] sm:$0xff]  ;;  %v3342_v4 = vpack.c.bf16 %v264_v2, %v261_v1  ;;  %v267_v6 = vld [vmem:[%s4006_s1 + $0x38] sm:$0xff]  ;;  %v270_v7 = vld [vmem:[%s4006_s1 + $0x50] sm:$0xff]  ;;  %2542 = vmatprep.subr.bf16.mxu1 %v3252_v8  ;;  %375 = vmatprep.mubr.f32.mxu0 %v3253_v9  ;;  %p503_p10 = scmp.lt.s32.totalorder %s3321_s27, 12  ;;  %s679_s14 = sadd.s32 1, %s3321_s27 }
  0x1d   : > { %v3355_v10 = vpack.c.bf16 %v263_v5, %v260_v3  ;;  %v3357_v11 = vpack.c.bf16 %v270_v7, %v267_v6  ;;  %v266_v12 = vld [vmem:[%s4006_s1 + $0x30] sm:$0xff]  ;;  %v269_v13 = vld [vmem:[%s4006_s1 + $0x48] sm:$0xff]  ;;  %2262 = vmatprep.mubr.msk.f32.mxu1 %vm3254_vm0, %v3253_v9  ;;  %v276_v15 = vld [vmem:[%s4006_s1 + $0x80] sm:$0xff]  ;;  %p680_p11 = scmp.lt.s32.totalorder %s679_s14, 12  ;;  %s857_s20 = sadd.s32 2, %s3321_s27 }
  0x1e   : > { %v273_v14 = vld [vmem:[%s4006_s1 + $0x68] sm:$0xff]  ;;  %2511 = vmatprep.subr.bf16.mxu0 %v3342_v4  ;;  %v3375_v16 = vpack.c.bf16 %v269_v13, %v266_v12  ;;  %v272_v18 = vld [vmem:[%s4006_s1 + $0x60] sm:$0xff]  ;;  %v275_v19 = vld [vmem:[%s4006_s1 + $0x78] sm:$0xff]  ;;  %s504_s13 = scalar_select %p503_p10, 1, 0 }
  0x1f   : > { %2513 = vmatpush1.bf16.msra.mxu0 %v3355_v10  ;;  %v3378_v17 = vpack.c.bf16 %v276_v15, %v273_v14  ;;  %v279_v20 = vld [vmem:[%s4006_s1 + $0x98] sm:$0xff]  ;;  %v282_v21 = vld [vmem:[%s4006_s1 + $0xb0] sm:$0xff]  ;;  %v3393_v22 = vpack.c.bf16 %v275_v19, %v272_v18  ;;  %v281_v25 = vld [vmem:[%s4006_s1 + $0xa8] sm:$0xff]  ;;  %v456_v19 = vlaneseq  ;;  %s681_s15 = scalar_select %p680_p11, 1, 0 }
  0x20   : > { %2515 = vmatprep.subr.bf16.mxu0 %v3357_v11  ;;  %v278_v23 = vld [vmem:[%s4006_s1 + $0x90] sm:$0xff]  ;;  %v3399_v24 = vpack.c.bf16 %v282_v21, %v279_v20  ;;  %v265_v27 = vld [vmem:[%s4006_s1 + $0x28] sm:$0xff]  ;;  %v288_v29 = vld [vmem:[%s4006_s1 + $0xe0] sm:$0xff]  ;;  %p858_p12 = scmp.lt.s32.totalorder %s857_s20, 12  ;;  %s1035_s24 = sadd.s32 3, %s3321_s27 }
  0x21   : > { %v262_v26 = vld [vmem:[%s4006_s1 + $0x10] sm:$0xff]  ;;  %v285_v28 = vld [vmem:[%s4006_s1 + $0xc8] sm:$0xff]  ;;  %v268_v31 = vld [vmem:[%s4006_s1 + $0x40] sm:$0xff]  ;;  %v3425_v33 = vpack.c.bf16 %v281_v25, %v278_v23  ;;  %v457_v20 = vshrl.u32 %v456_v19, 7  ;;  %p1036_p13 = scmp.lt.s32.totalorder %s1035_s24, 12  ;;  %s1213_s28 = sadd.s32 4, %s3321_s27 }
  0x22   : > { %v3416_v30 = vpack.c.bf16 %v265_v27, %v262_v26  ;;  %v271_v32 = vld [vmem:[%s4006_s1 + $0x58] sm:$0xff]  ;;  %v284_v34 = vld [vmem:[%s4006_s1 + $0xc0] sm:$0xff]  ;;  %v3434_v36 = vpack.c.bf16 %v288_v29, %v285_v28  ;;  %v274_v38 = vld [vmem:[%s4006_s1 + $0x70] sm:$0xff]  ;;  %s859_s22 = scalar_select %p858_p12, 1, 0 }
  0x23   : > { %2517 = vmatpush1.bf16.msra.mxu0 %v3375_v16  ;;  %v3431_v35 = vpack.c.bf16 %v271_v32, %v268_v31  ;;  %v287_v37 = vld [vmem:[%s4006_s1 + $0xd8] sm:$0xff]  ;;  %v277_v39 = vld [vmem:[%s4006_s1 + $0x88] sm:$0xff]  ;;  %v294_v41 = vld [vmem:[%s4006_s1 + $0x110] sm:$0xff]  ;;  %v458_v21 = vsub.s32 0, %v457_v20  ;;  %v462_v25 = vsub.s32 1, %v457_v20  ;;  %p1214_p0 = scmp.lt.s32.totalorder %s1213_s28, 12 }
  0x24   : > { %2519 = vmatprep.subr.bf16.mxu0 %v3378_v17  ;;  %2544 = vmatpush3.bf16.msra.mxu1 %v3416_v30  ;;  %v291_v40 = vld [vmem:[%s4006_s1 + $0xf8] sm:$0xff]  ;;  %v3453_v42 = vpack.c.bf16 %v287_v37, %v284_v34  ;;  %v290_v43 = vld [vmem:[%s4006_s1 + $0xf0] sm:$0xff]  ;;  %v3459_v44 = vpack.c.bf16 %v277_v39, %v274_v38  ;;  %v293_v46 = vld [vmem:[%s4006_s1 + $0x108] sm:$0xff]  ;;  %s1037_s26 = scalar_select %p1036_p13, 1, 0 }
  0x25   : > { %2545 = vmatprep.subr.bf16.mxu1 %v3252_v8  ;;  %v3462_v45 = vpack.c.bf16 %v294_v41, %v291_v40  ;;  %v280_v47 = vld [vmem:[%s4006_s1 + $0xa0] sm:$0xff]  ;;  %v283_v48 = vld [vmem:[%s4006_s1 + $0xb8] sm:$0xff]  ;;  %v297_v49 = vld [vmem:[%s4006_s1 + $0x128] sm:$0xff]  ;;  %v3481_v51 = vpack.c.bf16 %v293_v46, %v290_v43  ;;  %s1215_s29 = scalar_select %p1214_p0, 1, 0 }
  0x26   : > { %v300_v50 = vld [vmem:[%s4006_s1 + $0x140] sm:$0xff]  ;;  %v3487_v53 = vpack.c.bf16 %v283_v48, %v280_v47  ;;  %v299_v55 = vld [vmem:[%s4006_s1 + $0x138] sm:$0xff]  ;;  %v286_v56 = vld [vmem:[%s4006_s1 + $0xd0] sm:$0xff]  ;;  %s1391_s30 = sadd.s32 5, %s3321_s27  ;;  %s1569_s6 = sadd.s32 6, %s3321_s27 }
  0x27   : > { %2521 = vmatpush1.bf16.msra.mxu0 %v3393_v22  ;;  %v296_v52 = vld [vmem:[%s4006_s1 + $0x120] sm:$0xff]  ;;  %v3490_v54 = vpack.c.bf16 %v300_v50, %v297_v49  ;;  %v289_v57 = vld [vmem:[%s4006_s1 + $0xe8] sm:$0xff]  ;;  %v303_v58 = vld [vmem:[%s4006_s1 + $0x158] sm:$0xff]  ;;  %v466_v49 = vsub.s32 2, %v457_v20  ;;  %p1392_p1 = scmp.lt.s32.totalorder %s1391_s30, 12  ;;  %p1570_p2 = scmp.lt.s32.totalorder %s1569_s6, 12 }
  0x28   : > { %2523 = vmatprep.subr.bf16.mxu0 %v3399_v24  ;;  %2547 = vmatpush3.bf16.msra.mxu1 %v3431_v35  ;;  %v306_v59 = vld [vmem:[%s4006_s1 + $0x170] sm:$0xff]  ;;  %v3509_v60 = vpack.c.bf16 %v299_v55, %v296_v52  ;;  %v3515_v62 = vpack.c.bf16 %v289_v57, %v286_v56  ;;  %v305_v0 = vld [vmem:[%s4006_s1 + $0x168] sm:$0xff]  ;;  %v292_v1 = vld [vmem:[%s4006_s1 + $0x100] sm:$0xff]  ;;  %s1747_s10 = sadd.s32 7, %s3321_s27  ;;  %s2091_s12 = sshll.u32 (%p3309_p3), %s3209_s17, 6 }
  0x29   : > { %2548 = vmatprep.subr.bf16.mxu1 %v3252_v8  ;;  %v302_v61 = vld [vmem:[%s4006_s1 + $0x150] sm:$0xff]  ;;  %v3518_v63 = vpack.c.bf16 %v306_v59, %v303_v58  ;;  %v295_v2 = vld [vmem:[%s4006_s1 + $0x118] sm:$0xff]  ;;  %v301_v7 = vld [vmem:[%s4006_s1 + $0x148] sm:$0xff]  ;;  %s1393_s5 = scalar_select %p1392_p1, 1, 0 }
  0x2a   : > { %v3531_v3 = vpack.c.bf16 %v305_v0, %v302_v61  ;;  %v3534_v5 = vpack.c.bf16 %v295_v2, %v292_v1  ;;  %v298_v6 = vld [vmem:[%s4006_s1 + $0x130] sm:$0xff]  ;;  %v3545_v12 = vld [vmem:[#allocation2] sm:$0xff]  ;;  %v307_v15 = vld [vmem:[%s4006_s1 + $0x178] sm:$0xff]  ;;  %s1571_s9 = scalar_select %p1570_p2, 1, 0 }
  0x2b   : > { %2525 = vmatpush1.bf16.msra.mxu0 %v3425_v33  ;;  %v3548_v13 = vpack.c.bf16 %v301_v7, %v298_v6  ;;  %v304_v14 = vld [vmem:[%s4006_s1 + $0x160] sm:$0xff]  ;;  %v453_v31 = vld [vmem:[%s3328_s7 + $0x8] sm:$0xff]  ;;  %v454_v56 = vld [vmem:[%s3328_s7 + $0x10] sm:$0xff]  ;;  %v505_v7 = vstv %s504_s13  ;;  %p1748_p4 = scmp.lt.s32.totalorder %s1747_s10, 12 }
  0x2c   : > { %2527 = vmatprep.subr.bf16.mxu0 %v3434_v36  ;;  %2550 = vmatpush3.bf16.msra.mxu1 %v3459_v44  ;;  %v3560_v18 = vpack.c.bf16 %v307_v15, %v304_v14  ;;  %v308_v23 = vld [vmem:[%s4007_s2] sm:$0x7]  ;;  %vm506_vm1 = vcmp.eq.s32.totalorder %v505_v7, 1 }
  0x2d   : > { %2551 = vmatprep.subr.bf16.mxu1 %v3252_v8  ;;  %v3604_v26 = vrot.slane %v308_v23, %v458_v21  ;;  %v452_v27 = vld [vmem:[%s3328_s7] sm:$0xff]  ;;  %v3607_v28 = vrot.slane %v308_v23, %v462_v25  ;;  %v3617_v55 = vrot.slane %v308_v23, %v466_v49  ;;  %s1749_s11 = scalar_select %p1748_p4, 1, 0 }
  0x2e   : > { %v3615_v52 = vld [vmem:[%s4008_s3] ss:$0 sm:$0xff] }
  0x2f   : > { %2529 = vmatpush1.bf16.msra.mxu0 %v3453_v42  ;;  %v471_v29 = vadd.f32 %v3604_v26, %v452_v27  ;;  %v472_v34 = vadd.f32 %v3607_v28, %v453_v31  ;;  %v473_v59 = vadd.f32 %v3617_v55, %v454_v56  ;;  %v2033_v25 = vld [vmem:[%s3328_s7 + $0x20] sm:$0xff] }
  0x30   : > { %2531 = vmatprep.subr.bf16.mxu0 %v3462_v45  ;;  %2553 = vmatpush3.bf16.msra.mxu1 %v3487_v53  ;;  %v655_v31 = vadd.f32 %v2033_v25, %v3607_v28 }
  0x31   : > { %2554 = vmatprep.subr.bf16.mxu1 %v3252_v8 }
  0x33   : > { %2533 = vmatpush1.bf16.msra.mxu0 %v3481_v51 }
  0x34   : > { %2535 = vmatprep.subr.bf16.mxu0 %v3490_v54  ;;  %2556 = vmatpush3.bf16.msra.mxu1 %v3515_v62 }
  0x35   : > { %2557 = vmatprep.subr.bf16.mxu1 %v3252_v8 }
  0x37   : > { %2537 = vmatpush1.bf16.msra.mxu0 %v3509_v60 }
  0x38   : > { %2539 = vmatprep.subr.bf16.mxu0 %v3518_v63  ;;  %2559 = vmatpush3.bf16.msra.mxu1 %v3534_v5 }
  0x39   : > { %2560 = vmatprep.subr.bf16.mxu1 %v3252_v8 }
  0x3b   : > { %2541 = vmatpush1.bf16.msra.mxu0 %v3531_v3 }
  0x3c   : > { %2567 = vmatprep.subr.bf16.mxu0 %v3342_v4  ;;  %2562 = vmatpush3.bf16.msra.mxu1 %v3548_v13 }
  0x3d   : > { %2563 = vmatprep.subr.bf16.mxu1 %v3252_v8 }
  0x3e   : > { %376 = vmatmul.mubr.f32.vlgmr.msra.gmra.mrb[0].mxu0 %v3545_v12 }
  0x3f   : > { %2569 = vmatpush1.bf16.msra.mxu0 %v3355_v10  ;;  %573 = vmatprep.mubr.f32.mxu0 %v3253_v9 }
  0x40   : > { %2571 = vmatprep.subr.bf16.mxu0 %v3357_v11  ;;  %2565 = vmatpush3.bf16.msra.mxu1 %v3560_v18 }
  0x41   : > { %2598 = vmatprep.subr.bf16.mxu1 %v3252_v8 }
  0x43   : > { %2573 = vmatpush1.bf16.msra.mxu0 %v3375_v16  ;;  %2263 = vmatmul.mubr.f32.vlgmr.msra.gmra.mrb[0].mxu1 %v3545_v12 }
  0x44   : > { %2575 = vmatprep.subr.bf16.mxu0 %v3378_v17  ;;  %2600 = vmatpush3.bf16.msra.mxu1 %v3416_v30 }
  0x45   : > { %2601 = vmatprep.subr.bf16.mxu1 %v3252_v8  ;;  %2297 = vmatprep.mubr.msk.f32.mxu1 %vm3254_vm0, %v3253_v9 }
  0x47   : > { %2577 = vmatpush1.bf16.msra.mxu0 %v3393_v22 }
  0x48   : > { %2579 = vmatprep.subr.bf16.mxu0 %v3399_v24  ;;  %2603 = vmatpush3.bf16.msra.mxu1 %v3431_v35 }
  0x49   : > { %2604 = vmatprep.subr.bf16.mxu1 %v3252_v8 }
  0x4b   : > { %2581 = vmatpush1.bf16.msra.mxu0 %v3425_v33 }
  0x4c   : > { %2583 = vmatprep.subr.bf16.mxu0 %v3434_v36  ;;  %2606 = vmatpush3.bf16.msra.mxu1 %v3459_v44 }
  0x4d   : > { %2607 = vmatprep.subr.bf16.mxu1 %v3252_v8 }
  0x4f   : > { %2585 = vmatpush1.bf16.msra.mxu0 %v3453_v42 }
  0x50   : > { %2587 = vmatprep.subr.bf16.mxu0 %v3462_v45  ;;  %2609 = vmatpush3.bf16.msra.mxu1 %v3487_v53 }
  0x51   : > { %2610 = vmatprep.subr.bf16.mxu1 %v3252_v8 }
  0x53   : > { %2589 = vmatpush1.bf16.msra.mxu0 %v3481_v51 }
  0x54   : > { %2591 = vmatprep.subr.bf16.mxu0 %v3490_v54  ;;  %2612 = vmatpush3.bf16.msra.mxu1 %v3515_v62 }
  0x55   : > { %2613 = vmatprep.subr.bf16.mxu1 %v3252_v8 }
  0x57   : > { %2593 = vmatpush1.bf16.msra.mxu0 %v3509_v60 }
  0x58   : > { %2595 = vmatprep.subr.bf16.mxu0 %v3518_v63  ;;  %2615 = vmatpush3.bf16.msra.mxu1 %v3534_v5 }
  0x59   : > { %2616 = vmatprep.subr.bf16.mxu1 %v3252_v8 }
  0x5b   : > { %2597 = vmatpush1.bf16.msra.mxu0 %v3531_v3 }
  0x5c   : > { %2623 = vmatprep.subr.bf16.mxu0 %v3342_v4  ;;  %2618 = vmatpush3.bf16.msra.mxu1 %v3548_v13 }
  0x5d   : > { %2619 = vmatprep.subr.bf16.mxu1 %v3252_v8 }
  0x60   : > { %2621 = vmatpush3.bf16.msra.mxu1 %v3560_v18 }
  0x61   : > { %2654 = vmatprep.subr.bf16.mxu1 %v3252_v8 }
 0x111   : > { %v377_v32 = vpop.f32.mrb[0].mxu0 }
 0x112   : > { %v474_v37 = vadd.f32 %v471_v29, %v377_v32  ;;  %v379_v38 = vpop.f32.mrb[1].mxu0 }
 0x113   : > { %v481_v40 = vadd.f32 %v472_v34, %v379_v38 }
 0x114   : > { %v2028_v39 = vmul.f32 -1.442695, %v474_v37 }
 0x115   : > { %v2029_v41 = vmul.f32 -1.442695, %v481_v40 }
 0x116   : > { %3067 = vpow2.f32 %v2028_v39  ;;  %v448_v43 = vpop.f32.mrb[0].mxu1 }
 0x117   : > { %v2264_v46 = vpop.f32.mrb[1].mxu1  ;;  %3069 = vpow2.f32 %v2029_v41  ;;  %v494_v58 = vadd.f32 %v3615_v52, %v448_v43 }
 0x120   : > { %v3068_v47 = vpop.eup %3067 }
 0x121   : > { %v478_v48 = vadd.f32 1.0, %v3068_v47  ;;  %v3070_v50 = vpop.eup %3069  ;;  %v2034_v47 = vld [vmem:[%s3328_s7 + $0x28] sm:$0xff] }
 0x122   : > { %v485_v57 = vadd.f32 1.0, %v3070_v50  ;;  %v656_v49 = vadd.f32 %v2034_v47, %v3617_v55 }
 0x123   : > { %3071 = vrcp.f32 %v478_v48 }
 0x124   : > { %3073 = vrcp.f32 %v485_v57 }
 0x12d   : > { %v3072_v61 = vpop.eup %3071 }
 0x12e   : > { %v495_v0 = vmul.f32 %v3072_v61, %v494_v58  ;;  %v3074_v2 = vpop.eup %3073 }
 0x12f   : > { %v498_v6 = vsub.f32 1.0, %v3074_v2  ;;  %v500_v19 = vmul.f32 %v3074_v2, %v3545_v12 }
 0x130   : > { %v496_v1 = vadd.f32 %v495_v0, %v473_v59  ;;  %v682_v0 = vstv %s681_s15  ;;  %s3946_s15 = scalar_lea.vmem (%p3309_p3), %s4009_s4, %s2091_s12  }
 0x131   : > { %vm683_vm2 = vcmp.eq.s32.totalorder %v682_v0, 1 }
 0x132   : > { %3075 = vtanh.f32 %v496_v1 }
 0x13c   : > { %v3076_v14 = vpop.eup %3075 }
 0x13d   : > { %v499_v15 = vmul.f32 %v3076_v14, %v498_v6 }
 0x13f   : > { %v501_v20 = vadd.f32 %v500_v19, %v499_v15  ;;  %v2038_v15 = vld [vmem:[%s3328_s7 + $0x30] sm:$0xff] }
 0x140   : > { %v832_v19 = vadd.f32 %v2038_v15, %v3604_v26 }
 0x141   : > { %v3625_v21 = vsel %vm506_vm1, %v501_v20, %v3545_v12  ;;  %v2032_v12 = vld [vmem:[%s3328_s7 + $0x18] sm:$0xff] }
 0x142   : > { %508 = vst [vmem:[%s3330_s8] sm:$0xff] %v3625_v21  ;;  %574 = vmatmul.mubr.f32.vlgmr.msra.gmra.mrb[2].mxu0 %v3625_v21  ;;  %2298 = vmatmul.mubr.f32.vlgmr.msra.gmra.mrb[2].mxu1 %v3625_v21  ;;  %v654_v23 = vadd.f32 %v2032_v12, %v3604_v26  ;;  %v2039_v20 = vld [vmem:[%s3328_s7 + $0x38] sm:$0xff] }
 0x143   : > { %2625 = vmatpush1.bf16.msra.mxu0 %v3355_v10  ;;  %2656 = vmatpush3.bf16.msra.mxu1 %v3416_v30 }
 0x144   : > { %2627 = vmatprep.subr.bf16.mxu0 %v3357_v11  ;;  %2657 = vmatprep.subr.bf16.mxu1 %v3252_v8 }
 0x145   : > { %751 = vmatprep.mubr.f32.mxu0 %v3253_v9  ;;  %2332 = vmatprep.mubr.msk.f32.mxu1 %vm3254_vm0, %v3253_v9 }
 0x147   : > { %2629 = vmatpush1.bf16.msra.mxu0 %v3375_v16  ;;  %2659 = vmatpush3.bf16.msra.mxu1 %v3431_v35 }
 0x148   : > { %2631 = vmatprep.subr.bf16.mxu0 %v3378_v17  ;;  %2660 = vmatprep.subr.bf16.mxu1 %v3252_v8 }
 0x14b   : > { %2633 = vmatpush1.bf16.msra.mxu0 %v3393_v22  ;;  %2662 = vmatpush3.bf16.msra.mxu1 %v3459_v44 }
 0x14c   : > { %2635 = vmatprep.subr.bf16.mxu0 %v3399_v24  ;;  %2663 = vmatprep.subr.bf16.mxu1 %v3252_v8 }
 0x14f   : > { %2637 = vmatpush1.bf16.msra.mxu0 %v3425_v33  ;;  %2665 = vmatpush3.bf16.msra.mxu1 %v3487_v53 }
 0x150   : > { %2639 = vmatprep.subr.bf16.mxu0 %v3434_v36  ;;  %2666 = vmatprep.subr.bf16.mxu1 %v3252_v8 }
 0x153   : > { %2641 = vmatpush1.bf16.msra.mxu0 %v3453_v42  ;;  %2668 = vmatpush3.bf16.msra.mxu1 %v3515_v62 }
 0x154   : > { %2643 = vmatprep.subr.bf16.mxu0 %v3462_v45  ;;  %2669 = vmatprep.subr.bf16.mxu1 %v3252_v8 }
 0x157   : > { %2645 = vmatpush1.bf16.msra.mxu0 %v3481_v51  ;;  %2671 = vmatpush3.bf16.msra.mxu1 %v3534_v5 }
 0x158   : > { %2647 = vmatprep.subr.bf16.mxu0 %v3490_v54  ;;  %2672 = vmatprep.subr.bf16.mxu1 %v3252_v8 }
 0x15b   : > { %2649 = vmatpush1.bf16.msra.mxu0 %v3509_v60  ;;  %2674 = vmatpush3.bf16.msra.mxu1 %v3548_v13 }
 0x15c   : > { %2651 = vmatprep.subr.bf16.mxu0 %v3518_v63  ;;  %2675 = vmatprep.subr.bf16.mxu1 %v3252_v8 }
 0x15f   : > { %2653 = vmatpush1.bf16.msra.mxu0 %v3531_v3  ;;  %2677 = vmatpush3.bf16.msra.mxu1 %v3560_v18 }
 0x160   : > { %2679 = vmatprep.subr.bf16.mxu0 %v3342_v4  ;;  %2710 = vmatprep.subr.bf16.mxu1 %v3252_v8 }
 0x215   : > { %v575_v27 = vpop.f32.mrb[2].mxu0  ;;  %v646_v29 = vpop.f32.mrb[2].mxu1 }
 0x216   : > { %v657_v32 = vadd.f32 %v654_v23, %v575_v27  ;;  %v577_v34 = vpop.f32.mrb[3].mxu0  ;;  %v2299_v37 = vpop.f32.mrb[3].mxu1  ;;  %v671_v50 = vadd.f32 %v3615_v52, %v646_v29  ;;  %v833_v23 = vadd.f32 %v2039_v20, %v3607_v28 }
 0x217   : > { %v664_v39 = vadd.f32 %v655_v31, %v577_v34 }
 0x218   : > { %v2035_v38 = vmul.f32 -1.442695, %v657_v32 }
 0x219   : > { %v2036_v40 = vmul.f32 -1.442695, %v664_v39 }
 0x21a   : > { %3077 = vpow2.f32 %v2035_v38 }
 0x21b   : > { %3079 = vpow2.f32 %v2036_v40  ;;  %v2040_v40 = vld [vmem:[%s3328_s7 + $0x40] sm:$0xff] }
 0x224   : > { %v3078_v41 = vpop.eup %3077 }
 0x225   : > { %v661_v43 = vadd.f32 1.0, %v3078_v41  ;;  %v3080_v46 = vpop.eup %3079 }
 0x226   : > { %v668_v48 = vadd.f32 1.0, %v3080_v46 }
 0x227   : > { %3081 = vrcp.f32 %v661_v43  ;;  %v834_v43 = vadd.f32 %v2040_v40, %v3617_v55 }
 0x228   : > { %3083 = vrcp.f32 %v668_v48 }
 0x231   : > { %v3082_v56 = vpop.eup %3081 }
 0x232   : > { %v672_v57 = vmul.f32 %v3082_v56, %v671_v50  ;;  %v3084_v59 = vpop.eup %3083 }
 0x233   : > { %v675_v61 = vsub.f32 1.0, %v3084_v59  ;;  %v677_v6 = vmul.f32 %v3084_v59, %v3625_v21 }
 0x234   : > { %v673_v58 = vadd.f32 %v672_v57, %v656_v49  ;;  %v860_v57 = vstv %s859_s22 }
 0x235   : > { %vm861_vm3 = vcmp.eq.s32.totalorder %v860_v57, 1 }
 0x236   : > { %3085 = vtanh.f32 %v673_v58 }
 0x240   : > { %v3086_v1 = vpop.eup %3085 }
 0x241   : > { %v676_v2 = vmul.f32 %v3086_v1, %v675_v61 }
 0x243   : > { %v678_v7 = vadd.f32 %v677_v6, %v676_v2  ;;  %v2044_v2 = vld [vmem:[%s3328_s7 + $0x48] sm:$0xff] }
 0x244   : > { %v1010_v6 = vadd.f32 %v2044_v2, %v3604_v26 }
 0x245   : > { %v3676_v14 = vsel %vm683_vm2, %v678_v7, %v3625_v21  ;;  %v2045_v7 = vld [vmem:[%s3328_s7 + $0x50] sm:$0xff] }
 0x246   : > { %2037 = vst [vmem:[%s3330_s8 + $0x8] sm:$0xff] %v3676_v14  ;;  %752 = vmatmul.mubr.f32.vlgmr.msra.gmra.mrb[4].mxu0 %v3676_v14  ;;  %2333 = vmatmul.mubr.f32.vlgmr.msra.gmra.mrb[4].mxu1 %v3676_v14 }
 0x247   : > { %2681 = vmatpush1.bf16.msra.mxu0 %v3355_v10  ;;  %2712 = vmatpush3.bf16.msra.mxu1 %v3416_v30 }
 0x248   : > { %2683 = vmatprep.subr.bf16.mxu0 %v3357_v11  ;;  %2713 = vmatprep.subr.bf16.mxu1 %v3252_v8 }
 0x249   : > { %929 = vmatprep.mubr.f32.mxu0 %v3253_v9  ;;  %2367 = vmatprep.mubr.msk.f32.mxu1 %vm3254_vm0, %v3253_v9 }
 0x24b   : > { %2685 = vmatpush1.bf16.msra.mxu0 %v3375_v16  ;;  %2715 = vmatpush3.bf16.msra.mxu1 %v3431_v35 }
 0x24c   : > { %2687 = vmatprep.subr.bf16.mxu0 %v3378_v17  ;;  %2716 = vmatprep.subr.bf16.mxu1 %v3252_v8 }
 0x24f   : > { %2689 = vmatpush1.bf16.msra.mxu0 %v3393_v22  ;;  %2718 = vmatpush3.bf16.msra.mxu1 %v3459_v44 }
 0x250   : > { %2691 = vmatprep.subr.bf16.mxu0 %v3399_v24  ;;  %2719 = vmatprep.subr.bf16.mxu1 %v3252_v8 }
 0x253   : > { %2693 = vmatpush1.bf16.msra.mxu0 %v3425_v33  ;;  %2721 = vmatpush3.bf16.msra.mxu1 %v3487_v53 }
 0x254   : > { %2695 = vmatprep.subr.bf16.mxu0 %v3434_v36  ;;  %2722 = vmatprep.subr.bf16.mxu1 %v3252_v8 }
 0x257   : > { %2697 = vmatpush1.bf16.msra.mxu0 %v3453_v42  ;;  %2724 = vmatpush3.bf16.msra.mxu1 %v3515_v62 }
 0x258   : > { %2699 = vmatprep.subr.bf16.mxu0 %v3462_v45  ;;  %2725 = vmatprep.subr.bf16.mxu1 %v3252_v8 }
 0x25b   : > { %2701 = vmatpush1.bf16.msra.mxu0 %v3481_v51  ;;  %2727 = vmatpush3.bf16.msra.mxu1 %v3534_v5 }
 0x25c   : > { %2703 = vmatprep.subr.bf16.mxu0 %v3490_v54  ;;  %2728 = vmatprep.subr.bf16.mxu1 %v3252_v8 }
 0x25f   : > { %2705 = vmatpush1.bf16.msra.mxu0 %v3509_v60  ;;  %2730 = vmatpush3.bf16.msra.mxu1 %v3548_v13 }
 0x260   : > { %2707 = vmatprep.subr.bf16.mxu0 %v3518_v63  ;;  %2731 = vmatprep.subr.bf16.mxu1 %v3252_v8 }
 0x263   : > { %2709 = vmatpush1.bf16.msra.mxu0 %v3531_v3  ;;  %2733 = vmatpush3.bf16.msra.mxu1 %v3560_v18 }
 0x264   : > { %2735 = vmatprep.subr.bf16.mxu0 %v3342_v4  ;;  %2766 = vmatprep.subr.bf16.mxu1 %v3252_v8 }
 0x319   : > { %v753_v21 = vpop.f32.mrb[4].mxu0  ;;  %v824_v12 = vpop.f32.mrb[4].mxu1 }
 0x31a   : > { %v835_v25 = vadd.f32 %v832_v19, %v753_v21  ;;  %v755_v27 = vpop.f32.mrb[5].mxu0  ;;  %v2334_v29 = vpop.f32.mrb[5].mxu1  ;;  %v849_v46 = vadd.f32 %v3615_v52, %v824_v12  ;;  %v1011_v19 = vadd.f32 %v2045_v7, %v3607_v28 }
 0x31b   : > { %v842_v32 = vadd.f32 %v833_v23, %v755_v27 }
 0x31c   : > { %v2041_v31 = vmul.f32 -1.442695, %v835_v25 }
 0x31d   : > { %v2042_v34 = vmul.f32 -1.442695, %v842_v32 }
 0x31e   : > { %3087 = vpow2.f32 %v2041_v31 }
 0x31f   : > { %3089 = vpow2.f32 %v2042_v34  ;;  %v2046_v34 = vld [vmem:[%s3328_s7 + $0x58] sm:$0xff] }
 0x328   : > { %v3088_v37 = vpop.eup %3087 }
 0x329   : > { %v839_v38 = vadd.f32 1.0, %v3088_v37  ;;  %v3090_v39 = vpop.eup %3089 }
 0x32a   : > { %v846_v41 = vadd.f32 1.0, %v3090_v39 }
 0x32b   : > { %3091 = vrcp.f32 %v839_v38  ;;  %v1012_v38 = vadd.f32 %v2046_v34, %v3617_v55 }
 0x32c   : > { %3093 = vrcp.f32 %v846_v41 }
 0x335   : > { %v3092_v47 = vpop.eup %3091 }
 0x336   : > { %v850_v48 = vmul.f32 %v3092_v47, %v849_v46  ;;  %v3094_v50 = vpop.eup %3093 }
 0x337   : > { %v853_v56 = vsub.f32 1.0, %v3094_v50  ;;  %v855_v61 = vmul.f32 %v3094_v50, %v3676_v14 }
 0x338   : > { %v851_v49 = vadd.f32 %v850_v48, %v834_v43  ;;  %v1038_v48 = vstv %s1037_s26 }
 0x339   : > { %vm1039_vm4 = vcmp.eq.s32.totalorder %v1038_v48, 1 }
 0x33a   : > { %3095 = vtanh.f32 %v851_v49 }
 0x344   : > { %v3096_v58 = vpop.eup %3095 }
 0x345   : > { %v854_v59 = vmul.f32 %v3096_v58, %v853_v56 }
 0x347   : > { %v856_v0 = vadd.f32 %v855_v61, %v854_v59  ;;  %v2050_v59 = vld [vmem:[%s3328_s7 + $0x60] sm:$0xff] }
 0x348   : > { %v1188_v61 = vadd.f32 %v2050_v59, %v3604_v26 }
 0x349   : > { %v3727_v1 = vsel %vm861_vm3, %v856_v0, %v3676_v14  ;;  %v2051_v0 = vld [vmem:[%s3328_s7 + $0x68] sm:$0xff] }
 0x34a   : > { %2043 = vst [vmem:[%s3330_s8 + $0x10] sm:$0xff] %v3727_v1  ;;  %930 = vmatmul.mubr.f32.vlgmr.msra.gmra.mrb[6].mxu0 %v3727_v1  ;;  %2368 = vmatmul.mubr.f32.vlgmr.msra.gmra.mrb[6].mxu1 %v3727_v1 }
 0x34b   : > { %2737 = vmatpush1.bf16.msra.mxu0 %v3355_v10  ;;  %2768 = vmatpush3.bf16.msra.mxu1 %v3416_v30 }
 0x34c   : > { %2739 = vmatprep.subr.bf16.mxu0 %v3357_v11  ;;  %2769 = vmatprep.subr.bf16.mxu1 %v3252_v8 }
 0x34d   : > { %1107 = vmatprep.mubr.f32.mxu0 %v3253_v9  ;;  %2402 = vmatprep.mubr.msk.f32.mxu1 %vm3254_vm0, %v3253_v9 }
 0x34f   : > { %2741 = vmatpush1.bf16.msra.mxu0 %v3375_v16  ;;  %2771 = vmatpush3.bf16.msra.mxu1 %v3431_v35 }
 0x350   : > { %2743 = vmatprep.subr.bf16.mxu0 %v3378_v17  ;;  %2772 = vmatprep.subr.bf16.mxu1 %v3252_v8 }
 0x353   : > { %2745 = vmatpush1.bf16.msra.mxu0 %v3393_v22  ;;  %2774 = vmatpush3.bf16.msra.mxu1 %v3459_v44 }
 0x354   : > { %2747 = vmatprep.subr.bf16.mxu0 %v3399_v24  ;;  %2775 = vmatprep.subr.bf16.mxu1 %v3252_v8 }
 0x357   : > { %2749 = vmatpush1.bf16.msra.mxu0 %v3425_v33  ;;  %2777 = vmatpush3.bf16.msra.mxu1 %v3487_v53 }
 0x358   : > { %2751 = vmatprep.subr.bf16.mxu0 %v3434_v36  ;;  %2778 = vmatprep.subr.bf16.mxu1 %v3252_v8 }
 0x35b   : > { %2753 = vmatpush1.bf16.msra.mxu0 %v3453_v42  ;;  %2780 = vmatpush3.bf16.msra.mxu1 %v3515_v62 }
 0x35c   : > { %2755 = vmatprep.subr.bf16.mxu0 %v3462_v45  ;;  %2781 = vmatprep.subr.bf16.mxu1 %v3252_v8 }
 0x35f   : > { %2757 = vmatpush1.bf16.msra.mxu0 %v3481_v51  ;;  %2783 = vmatpush3.bf16.msra.mxu1 %v3534_v5 }
 0x360   : > { %2759 = vmatprep.subr.bf16.mxu0 %v3490_v54  ;;  %2784 = vmatprep.subr.bf16.mxu1 %v3252_v8 }
 0x363   : > { %2761 = vmatpush1.bf16.msra.mxu0 %v3509_v60  ;;  %2786 = vmatpush3.bf16.msra.mxu1 %v3548_v13 }
 0x364   : > { %2763 = vmatprep.subr.bf16.mxu0 %v3518_v63  ;;  %2787 = vmatprep.subr.bf16.mxu1 %v3252_v8 }
 0x367   : > { %2765 = vmatpush1.bf16.msra.mxu0 %v3531_v3  ;;  %2789 = vmatpush3.bf16.msra.mxu1 %v3560_v18 }
 0x368   : > { %2791 = vmatprep.subr.bf16.mxu0 %v3342_v4  ;;  %2822 = vmatprep.subr.bf16.mxu1 %v3252_v8 }
 0x41d   : > { %v931_v14 = vpop.f32.mrb[6].mxu0  ;;  %v1002_v15 = vpop.f32.mrb[6].mxu1 }
 0x41e   : > { %v1013_v20 = vadd.f32 %v1010_v6, %v931_v14  ;;  %v933_v21 = vpop.f32.mrb[7].mxu0  ;;  %v2369_v12 = vpop.f32.mrb[7].mxu1  ;;  %v1027_v39 = vadd.f32 %v3615_v52, %v1002_v15  ;;  %v1189_v6 = vadd.f32 %v2051_v0, %v3607_v28 }
 0x41f   : > { %v1020_v25 = vadd.f32 %v1011_v19, %v933_v21 }
 0x420   : > { %v2047_v23 = vmul.f32 -1.442695, %v1013_v20 }
 0x421   : > { %v2048_v27 = vmul.f32 -1.442695, %v1020_v25 }
 0x422   : > { %3097 = vpow2.f32 %v2047_v23 }
 0x423   : > { %3099 = vpow2.f32 %v2048_v27  ;;  %v2052_v27 = vld [vmem:[%s3328_s7 + $0x70] sm:$0xff] }
 0x42c   : > { %v3098_v29 = vpop.eup %3097 }
 0x42d   : > { %v1017_v31 = vadd.f32 1.0, %v3098_v29  ;;  %v3100_v32 = vpop.eup %3099 }
 0x42e   : > { %v1024_v37 = vadd.f32 1.0, %v3100_v32 }
 0x42f   : > { %3101 = vrcp.f32 %v1017_v31  ;;  %v1190_v31 = vadd.f32 %v2052_v27, %v3617_v55 }
 0x430   : > { %3103 = vrcp.f32 %v1024_v37 }
 0x439   : > { %v3102_v40 = vpop.eup %3101 }
 0x43a   : > { %v1028_v41 = vmul.f32 %v3102_v40, %v1027_v39  ;;  %v3104_v46 = vpop.eup %3103 }
 0x43b   : > { %v1031_v47 = vsub.f32 1.0, %v3104_v46  ;;  %v1033_v56 = vmul.f32 %v3104_v46, %v3727_v1 }
 0x43c   : > { %v1029_v43 = vadd.f32 %v1028_v41, %v1012_v38  ;;  %v1216_v41 = vstv %s1215_s29 }
 0x43d   : > { %vm1217_vm5 = vcmp.eq.s32.totalorder %v1216_v41, 1 }
 0x43e   : > { %3105 = vtanh.f32 %v1029_v43 }
 0x448   : > { %v3106_v49 = vpop.eup %3105 }
 0x449   : > { %v1032_v50 = vmul.f32 %v3106_v49, %v1031_v47 }
 0x44b   : > { %v1034_v57 = vadd.f32 %v1033_v56, %v1032_v50  ;;  %v2056_v50 = vld [vmem:[%s3328_s7 + $0x78] sm:$0xff] }
 0x44c   : > { %v1366_v56 = vadd.f32 %v2056_v50, %v3604_v26  ;;  %v2068_v50 = vld [vmem:[%s3328_s7 + $0xa8] sm:$0xff] }
 0x44d   : > { %v3778_v58 = vsel %vm1039_vm4, %v1034_v57, %v3727_v1  ;;  %v2057_v57 = vld [vmem:[%s3328_s7 + $0x80] sm:$0xff] }
 0x44e   : > { %2049 = vst [vmem:[%s3330_s8 + $0x18] sm:$0xff] %v3778_v58  ;;  %1108 = vmatmul.mubr.f32.vlgmr.msra.gmra.mrb[8].mxu0 %v3778_v58  ;;  %2403 = vmatmul.mubr.f32.vlgmr.msra.gmra.mrb[8].mxu1 %v3778_v58 }
 0x44f   : > { %2793 = vmatpush1.bf16.msra.mxu0 %v3355_v10  ;;  %2824 = vmatpush3.bf16.msra.mxu1 %v3416_v30 }
 0x450   : > { %2795 = vmatprep.subr.bf16.mxu0 %v3357_v11  ;;  %2825 = vmatprep.subr.bf16.mxu1 %v3252_v8 }
 0x451   : > { %1285 = vmatprep.mubr.f32.mxu0 %v3253_v9  ;;  %2437 = vmatprep.mubr.msk.f32.mxu1 %vm3254_vm0, %v3253_v9 }
 0x453   : > { %2797 = vmatpush1.bf16.msra.mxu0 %v3375_v16  ;;  %2827 = vmatpush3.bf16.msra.mxu1 %v3431_v35 }
 0x454   : > { %2799 = vmatprep.subr.bf16.mxu0 %v3378_v17  ;;  %2828 = vmatprep.subr.bf16.mxu1 %v3252_v8 }
 0x457   : > { %2801 = vmatpush1.bf16.msra.mxu0 %v3393_v22  ;;  %2830 = vmatpush3.bf16.msra.mxu1 %v3459_v44 }
 0x458   : > { %2803 = vmatprep.subr.bf16.mxu0 %v3399_v24  ;;  %2831 = vmatprep.subr.bf16.mxu1 %v3252_v8 }
 0x45b   : > { %2805 = vmatpush1.bf16.msra.mxu0 %v3425_v33  ;;  %2833 = vmatpush3.bf16.msra.mxu1 %v3487_v53 }
 0x45c   : > { %2807 = vmatprep.subr.bf16.mxu0 %v3434_v36  ;;  %2834 = vmatprep.subr.bf16.mxu1 %v3252_v8 }
 0x45f   : > { %2809 = vmatpush1.bf16.msra.mxu0 %v3453_v42  ;;  %2836 = vmatpush3.bf16.msra.mxu1 %v3515_v62 }
 0x460   : > { %2811 = vmatprep.subr.bf16.mxu0 %v3462_v45  ;;  %2837 = vmatprep.subr.bf16.mxu1 %v3252_v8 }
 0x463   : > { %2813 = vmatpush1.bf16.msra.mxu0 %v3481_v51  ;;  %2839 = vmatpush3.bf16.msra.mxu1 %v3534_v5 }
 0x464   : > { %2815 = vmatprep.subr.bf16.mxu0 %v3490_v54  ;;  %2840 = vmatprep.subr.bf16.mxu1 %v3252_v8 }
 0x467   : > { %2817 = vmatpush1.bf16.msra.mxu0 %v3509_v60  ;;  %2842 = vmatpush3.bf16.msra.mxu1 %v3548_v13 }
 0x468   : > { %2819 = vmatprep.subr.bf16.mxu0 %v3518_v63  ;;  %2843 = vmatprep.subr.bf16.mxu1 %v3252_v8 }
 0x46b   : > { %2821 = vmatpush1.bf16.msra.mxu0 %v3531_v3  ;;  %2845 = vmatpush3.bf16.msra.mxu1 %v3560_v18 }
 0x46c   : > { %2847 = vmatprep.subr.bf16.mxu0 %v3342_v4  ;;  %2878 = vmatprep.subr.bf16.mxu1 %v3252_v8 }
 0x521   : > { %v1109_v1 = vpop.f32.mrb[8].mxu0  ;;  %v1180_v2 = vpop.f32.mrb[8].mxu1 }
 0x522   : > { %v1191_v7 = vadd.f32 %v1188_v61, %v1109_v1  ;;  %v1111_v14 = vpop.f32.mrb[9].mxu0  ;;  %v2404_v15 = vpop.f32.mrb[9].mxu1  ;;  %v1205_v32 = vadd.f32 %v3615_v52, %v1180_v2  ;;  %v1367_v61 = vadd.f32 %v2057_v57, %v3607_v28  ;;  %v2069_v57 = vld [vmem:[%s3328_s7 + $0xb0] sm:$0xff] }
 0x523   : > { %v1198_v20 = vadd.f32 %v1189_v6, %v1111_v14 }
 0x524   : > { %v2053_v19 = vmul.f32 -1.442695, %v1191_v7 }
 0x525   : > { %v2054_v21 = vmul.f32 -1.442695, %v1198_v20  ;;  %v2058_v20 = vld [vmem:[%s3328_s7 + $0x88] sm:$0xff] }
 0x526   : > { %3107 = vpow2.f32 %v2053_v19 }
 0x527   : > { %3109 = vpow2.f32 %v2054_v21 }
 0x530   : > { %v3108_v12 = vpop.eup %3107 }
 0x531   : > { %v1195_v23 = vadd.f32 1.0, %v3108_v12  ;;  %v3110_v25 = vpop.eup %3109  ;;  %v1368_v12 = vadd.f32 %v2058_v20, %v3617_v55 }
 0x532   : > { %v1202_v29 = vadd.f32 1.0, %v3110_v25 }
 0x533   : > { %3111 = vrcp.f32 %v1195_v23 }
 0x534   : > { %3113 = vrcp.f32 %v1202_v29 }
 0x53d   : > { %v3112_v34 = vpop.eup %3111 }
 0x53e   : > { %v1206_v37 = vmul.f32 %v3112_v34, %v1205_v32  ;;  %v3114_v39 = vpop.eup %3113  ;;  %v1394_v34 = vstv %s1393_s5 }
 0x53f   : > { %v1209_v40 = vsub.f32 1.0, %v3114_v39  ;;  %v1211_v47 = vmul.f32 %v3114_v39, %v3778_v58  ;;  %vm1395_vm6 = vcmp.eq.s32.totalorder %v1394_v34, 1 }
 0x540   : > { %v1207_v38 = vadd.f32 %v1206_v37, %v1190_v31 }
 0x542   : > { %3115 = vtanh.f32 %v1207_v38 }
 0x54c   : > { %v3116_v43 = vpop.eup %3115 }
 0x54d   : > { %v1210_v46 = vmul.f32 %v3116_v43, %v1209_v40 }
 0x54f   : > { %v1212_v48 = vadd.f32 %v1211_v47, %v1210_v46 }
 0x551   : > { %v3829_v49 = vsel %vm1217_vm5, %v1212_v48, %v3778_v58 }
 0x552   : > { %2055 = vst [vmem:[%s3330_s8 + $0x20] sm:$0xff] %v3829_v49  ;;  %1286 = vmatmul.mubr.f32.vlgmr.msra.gmra.mrb[10].mxu0 %v3829_v49  ;;  %2438 = vmatmul.mubr.f32.vlgmr.msra.gmra.mrb[10].mxu1 %v3829_v49 }
 0x553   : > { %2849 = vmatpush1.bf16.msra.mxu0 %v3355_v10  ;;  %2880 = vmatpush3.bf16.msra.mxu1 %v3416_v30 }
 0x554   : > { %2851 = vmatprep.subr.bf16.mxu0 %v3357_v11  ;;  %2881 = vmatprep.subr.bf16.mxu1 %v3252_v8 }
 0x555   : > { %1463 = vmatprep.mubr.f32.mxu0 %v3253_v9  ;;  %2472 = vmatprep.mubr.msk.f32.mxu1 %vm3254_vm0, %v3253_v9 }
 0x557   : > { %2853 = vmatpush1.bf16.msra.mxu0 %v3375_v16  ;;  %2883 = vmatpush3.bf16.msra.mxu1 %v3431_v35 }
 0x558   : > { %2855 = vmatprep.subr.bf16.mxu0 %v3378_v17  ;;  %2884 = vmatprep.subr.bf16.mxu1 %v3252_v8 }
 0x55b   : > { %2857 = vmatpush1.bf16.msra.mxu0 %v3393_v22  ;;  %2886 = vmatpush3.bf16.msra.mxu1 %v3459_v44 }
 0x55c   : > { %2859 = vmatprep.subr.bf16.mxu0 %v3399_v24  ;;  %2887 = vmatprep.subr.bf16.mxu1 %v3252_v8 }
 0x55f   : > { %2861 = vmatpush1.bf16.msra.mxu0 %v3425_v33  ;;  %2889 = vmatpush3.bf16.msra.mxu1 %v3487_v53 }
 0x560   : > { %2863 = vmatprep.subr.bf16.mxu0 %v3434_v36  ;;  %2890 = vmatprep.subr.bf16.mxu1 %v3252_v8 }
 0x563   : > { %2865 = vmatpush1.bf16.msra.mxu0 %v3453_v42  ;;  %2892 = vmatpush3.bf16.msra.mxu1 %v3515_v62 }
 0x564   : > { %2867 = vmatprep.subr.bf16.mxu0 %v3462_v45  ;;  %2893 = vmatprep.subr.bf16.mxu1 %v3252_v8 }
 0x567   : > { %2869 = vmatpush1.bf16.msra.mxu0 %v3481_v51  ;;  %2895 = vmatpush3.bf16.msra.mxu1 %v3534_v5 }
 0x568   : > { %2871 = vmatprep.subr.bf16.mxu0 %v3490_v54  ;;  %2896 = vmatprep.subr.bf16.mxu1 %v3252_v8 }
 0x56b   : > { %2873 = vmatpush1.bf16.msra.mxu0 %v3509_v60  ;;  %2898 = vmatpush3.bf16.msra.mxu1 %v3548_v13 }
 0x56c   : > { %2875 = vmatprep.subr.bf16.mxu0 %v3518_v63  ;;  %2899 = vmatprep.subr.bf16.mxu1 %v3252_v8 }
 0x56f   : > { %2877 = vmatpush1.bf16.msra.mxu0 %v3531_v3  ;;  %2901 = vmatpush3.bf16.msra.mxu1 %v3560_v18 }
 0x570   : > { %2903 = vmatprep.subr.bf16.mxu0 %v3342_v4  ;;  %2934 = vmatprep.subr.bf16.mxu1 %v3252_v8 }
 0x625   : > { %v1287_v58 = vpop.f32.mrb[10].mxu0  ;;  %v1358_v59 = vpop.f32.mrb[10].mxu1 }
 0x626   : > { %v1369_v0 = vadd.f32 %v1366_v56, %v1287_v58  ;;  %v1289_v1 = vpop.f32.mrb[11].mxu0  ;;  %v2439_v2 = vpop.f32.mrb[11].mxu1  ;;  %v1383_v23 = vadd.f32 %v3615_v52, %v1358_v59  ;;  %v1722_v56 = vadd.f32 %v2068_v50, %v3604_v26 }
 0x627   : > { %v1376_v7 = vadd.f32 %v1367_v61, %v1289_v1  ;;  %v1723_v61 = vadd.f32 %v2069_v57, %v3607_v28 }
 0x628   : > { %v2059_v6 = vmul.f32 -1.442695, %v1369_v0 }
 0x629   : > { %v2060_v14 = vmul.f32 -1.442695, %v1376_v7 }
 0x62a   : > { %3117 = vpow2.f32 %v2059_v6 }
 0x62b   : > { %3119 = vpow2.f32 %v2060_v14 }
 0x634   : > { %v3118_v4 = vpop.eup %3117 }
 0x635   : > { %v1373_v15 = vadd.f32 1.0, %v3118_v4  ;;  %v3120_v19 = vpop.eup %3119 }
 0x636   : > { %v1380_v21 = vadd.f32 1.0, %v3120_v19 }
 0x637   : > { %3121 = vrcp.f32 %v1373_v15 }
 0x638   : > { %3123 = vrcp.f32 %v1380_v21 }
 0x641   : > { %v3122_v25 = vpop.eup %3121 }
 0x642   : > { %v1384_v27 = vmul.f32 %v3122_v25, %v1383_v23  ;;  %v3124_v31 = vpop.eup %3123 }
 0x643   : > { %v1387_v32 = vsub.f32 1.0, %v3124_v31  ;;  %v1389_v39 = vmul.f32 %v3124_v31, %v3829_v49  ;;  %v1750_v31 = vstv %s1749_s11 }
 0x644   : > { %v1385_v29 = vadd.f32 %v1384_v27, %v1368_v12  ;;  %vm1751_vm8 = vcmp.eq.s32.totalorder %v1750_v31, 1 }
 0x646   : > { %3125 = vtanh.f32 %v1385_v29 }
 0x650   : > { %v3126_v37 = vpop.eup %3125 }
 0x651   : > { %v1388_v38 = vmul.f32 %v3126_v37, %v1387_v32 }
 0x653   : > { %v1390_v40 = vadd.f32 %v1389_v39, %v1388_v38 }
 0x655   : > { %v3880_v41 = vsel %vm1395_vm6, %v1390_v40, %v3829_v49 }
 0x656   : > { %2061 = vst [vmem:[%s3330_s8 + $0x28] sm:$0xff] %v3880_v41  ;;  %1464 = vmatmul.mubr.f32.vlgmr.msra.gmra.mrb[12].mxu0 %v3880_v41  ;;  %2473 = vmatmul.mubr.f32.vlgmr.msra.gmra.mrb[12].mxu1 %v3880_v41 }
 0x657   : > { %2905 = vmatpush1.bf16.msra.mxu0 %v3355_v10  ;;  %2936 = vmatpush3.bf16.msra.mxu1 %v3416_v30 }
 0x658   : > { %2907 = vmatprep.subr.bf16.mxu0 %v3357_v11  ;;  %2937 = vmatprep.subr.bf16.mxu1 %v3252_v8  ;;  %v2063_v11 = vld [vmem:[%s3328_s7 + $0x98] sm:$0xff] }
 0x659   : > { %1641 = vmatprep.mubr.f32.mxu0 %v3253_v9  ;;  %2507 = vmatprep.mubr.msk.f32.mxu1 %vm3254_vm0, %v3253_v9  ;;  %v2062_v9 = vld [vmem:[%s3328_s7 + $0x90] sm:$0xff] }
 0x65a   : > { %v1544_v10 = vadd.f32 %v2062_v9, %v3604_v26  ;;  %v2070_v26 = vld [vmem:[%s3328_s7 + $0xb8] sm:$0xff] }
 0x65b   : > { %2909 = vmatpush1.bf16.msra.mxu0 %v3375_v16  ;;  %2939 = vmatpush3.bf16.msra.mxu1 %v3431_v35  ;;  %v1724_v21 = vadd.f32 %v2070_v26, %v3617_v55 }
 0x65c   : > { %2911 = vmatprep.subr.bf16.mxu0 %v3378_v17  ;;  %2940 = vmatprep.subr.bf16.mxu1 %v3252_v8 }
 0x65f   : > { %2913 = vmatpush1.bf16.msra.mxu0 %v3393_v22  ;;  %2942 = vmatpush3.bf16.msra.mxu1 %v3459_v44  ;;  %v1545_v22 = vadd.f32 %v2063_v11, %v3607_v28 }
 0x660   : > { %2915 = vmatprep.subr.bf16.mxu0 %v3399_v24  ;;  %2943 = vmatprep.subr.bf16.mxu1 %v3252_v8 }
 0x663   : > { %2917 = vmatpush1.bf16.msra.mxu0 %v3425_v33  ;;  %2945 = vmatpush3.bf16.msra.mxu1 %v3487_v53 }
 0x664   : > { %2919 = vmatprep.subr.bf16.mxu0 %v3434_v36  ;;  %2946 = vmatprep.subr.bf16.mxu1 %v3252_v8 }
 0x667   : > { %2921 = vmatpush1.bf16.msra.mxu0 %v3453_v42  ;;  %2948 = vmatpush3.bf16.msra.mxu1 %v3515_v62 }
 0x668   : > { %2923 = vmatprep.subr.bf16.mxu0 %v3462_v45  ;;  %2949 = vmatprep.subr.bf16.mxu1 %v3252_v8 }
 0x66b   : > { %2925 = vmatpush1.bf16.msra.mxu0 %v3481_v51  ;;  %2951 = vmatpush3.bf16.msra.mxu1 %v3534_v5  ;;  %v2064_v51 = vld [vmem:[%s3328_s7 + $0xa0] sm:$0xff]  ;;  %s1764_s7 = ssub.s32 (%p3309_p3), 12, %s3321_s27 }
 0x66c   : > { %2927 = vmatprep.subr.bf16.mxu0 %v3490_v54  ;;  %2952 = vmatprep.subr.bf16.mxu1 %v3252_v8  ;;  %v1546_v54 = vadd.f32 %v2064_v51, %v3617_v55  ;;  %p1765_p5 = scmp.lt.s32.totalorder (%p3309_p3), %s1764_s7, 8 }
 0x66f   : > { %2929 = vmatpush1.bf16.msra.mxu0 %v3509_v60  ;;  %2954 = vmatpush3.bf16.msra.mxu1 %v3548_v13 }
 0x670   : > { %2931 = vmatprep.subr.bf16.mxu0 %v3518_v63  ;;  %2955 = vmatprep.subr.bf16.mxu1 %v3252_v8 }
 0x673   : > { %2933 = vmatpush1.bf16.msra.mxu0 %v3531_v3  ;;  %2957 = vmatpush3.bf16.msra.mxu1 %v3560_v18  ;;  %v1572_v18 = vstv %s1571_s9 }
 0x674   : > { %vm1573_vm7 = vcmp.eq.s32.totalorder %v1572_v18, 1 }
 0x729   : > { %v1465_v16 = vpop.f32.mrb[12].mxu0  ;;  %v1536_v17 = vpop.f32.mrb[12].mxu1 }
 0x72a   : > { %v1547_v24 = vadd.f32 %v1544_v10, %v1465_v16  ;;  %v1467_v30 = vpop.f32.mrb[13].mxu0  ;;  %v2474_v33 = vpop.f32.mrb[13].mxu1  ;;  %v1561_v60 = vadd.f32 %v3615_v52, %v1536_v17 }
 0x72b   : > { %v1554_v36 = vadd.f32 %v1545_v22, %v1467_v30 }
 0x72c   : > { %v2065_v35 = vmul.f32 -1.442695, %v1547_v24 }
 0x72d   : > { %v2066_v8 = vmul.f32 -1.442695, %v1554_v36 }
 0x72e   : > { %3127 = vpow2.f32 %v2065_v35 }
 0x72f   : > { %3129 = vpow2.f32 %v2066_v8 }
 0x738   : > { %v3128_v42 = vpop.eup %3127 }
 0x739   : > { %v1551_v44 = vadd.f32 1.0, %v3128_v42  ;;  %v3130_v45 = vpop.eup %3129 }
 0x73a   : > { %v1558_v53 = vadd.f32 1.0, %v3130_v45 }
 0x73b   : > { %3131 = vrcp.f32 %v1551_v44 }
 0x73c   : > { %3133 = vrcp.f32 %v1558_v53 }
 0x745   : > { %v3132_v62 = vpop.eup %3131 }
 0x746   : > { %v1562_v63 = vmul.f32 %v3132_v62, %v1561_v60  ;;  %v3134_v5 = vpop.eup %3133 }
 0x747   : > { %v1565_v13 = vsub.f32 1.0, %v3134_v5  ;;  %v1567_v47 = vmul.f32 %v3134_v5, %v3880_v41 }
 0x748   : > { %v1563_v3 = vadd.f32 %v1562_v63, %v1546_v54 }
 0x74a   : > { %3135 = vtanh.f32 %v1563_v3 }
 0x754   : > { %v3136_v43 = vpop.eup %3135 }
 0x755   : > { %v1566_v46 = vmul.f32 %v3136_v43, %v1565_v13 }
 0x757   : > { %v1568_v48 = vadd.f32 %v1567_v47, %v1566_v46 }
 0x759   : > { %v1574_v49 = vsel %vm1573_vm7, %v1568_v48, %v3880_v41 }
 0x75a   : > { %2067 = vst [vmem:[%s3330_s8 + $0x30] sm:$0xff] %v1574_v49  ;;  %1642 = vmatmul.mubr.f32.vlgmr.msra.gmra.mrb[14].mxu0 %v1574_v49  ;;  %2508 = vmatmul.mubr.f32.vlgmr.msra.gmra.mrb[14].mxu1 %v1574_v49 }
 0x82d   : > { %v1643_v58 = vpop.f32.mrb[14].mxu0  ;;  %v1714_v59 = vpop.f32.mrb[14].mxu1 }
 0x82e   : > { %v1725_v0 = vadd.f32 %v1722_v56, %v1643_v58  ;;  %v1645_v1 = vpop.f32.mrb[15].mxu0  ;;  %v2509_v2 = vpop.f32.mrb[15].mxu1  ;;  %v1739_v12 = vadd.f32 %v3615_v52, %v1714_v59 }
 0x82f   : > { %v1732_v7 = vadd.f32 %v1723_v61, %v1645_v1 }
 0x830   : > { %v2071_v6 = vmul.f32 -1.442695, %v1725_v0 }
 0x831   : > { %v2072_v14 = vmul.f32 -1.442695, %v1732_v7 }
 0x832   : > { %3137 = vpow2.f32 %v2071_v6 }
 0x833   : > { %3139 = vpow2.f32 %v2072_v14 }
 0x83c   : > { %v3138_v4 = vpop.eup %3137 }
 0x83d   : > { %v1729_v15 = vadd.f32 1.0, %v3138_v4  ;;  %v3140_v19 = vpop.eup %3139 }
 0x83e   : > { %v1736_v20 = vadd.f32 1.0, %v3140_v19 }
 0x83f   : > { %3141 = vrcp.f32 %v1729_v15 }
 0x840   : > { %3143 = vrcp.f32 %v1736_v20 }
 0x849   : > { %v3142_v28 = vpop.eup %3141 }
 0x84a   : > { %v1740_v23 = vmul.f32 %v3142_v28, %v1739_v12  ;;  %v3144_v27 = vpop.eup %3143 }
 0x84b   : > { %v1743_v29 = vsub.f32 1.0, %v3144_v27  ;;  %v1745_v37 = vmul.f32 %v3144_v27, %v1574_v49 }
 0x84c   : > { %v1741_v25 = vadd.f32 %v1740_v23, %v1724_v21 }
 0x84e   : > { %3145 = vtanh.f32 %v1741_v25 }
 0x858   : > { %v3146_v32 = vpop.eup %3145  ;;  %1762 = sbr.rel (!%p3309_p3) target bundleno = 2192 (0x890), region = 44 }
 0x859   : > { %v1744_v34 = vmul.f32 %v3146_v32, %v1743_v29 }
 0x85b   : > { %v1746_v38 = vadd.f32 %v1745_v37, %v1744_v34 }
 0x85d   : > { %v1752_v55 = vsel %vm1751_vm8, %v1746_v38, %v1574_v49 }
 0x85e   : > { %2073 = vst [vmem:[%s3330_s8 + $0x38] sm:$0xff] %v1752_v55  ;;  %1755 = vst [vmem:[#allocation2] sm:$0xff] %v1752_v55 }
 0x85f   : > { %s4021_s7 = smov (!%p1765_p5, %s1764_s7), 8 }
 0x860   : > { %s2076_s20 = sshll.u32 %s4021_s7, 7 }
 0x861   : > { %p2079_p6 = scmp.eq.s32.totalorder %s2076_s20, 0 }
 0x862   : > { %s3952_s22 = sshrl.u32 (!%p2079_p6), %s4021_s7, 3 }
 0x863   : > { %1774 = sbr.rel (%p2079_p6) target bundleno = 2192 (0x890), region = 48  ;;  %p2080_p3 = scmp.le.s32.totalorder (!%p2079_p6), %s3952_s22, 0 }
 0x86a   : > { %1967 = sbr.rel (%p2080_p3) target bundleno = 2171 (0x87b), region = 138  ;;  %s4011_s17 = smov (!%p2080_p3), %s3946_s15 }
 0x86b   : > { %s4012_s23 = smov (!%p2080_p3), %s3330_s8  ;;  %s3961_s27 = smov (!%p2080_p3), 0  }
 0x86c   : > { %s3963_s24 = smov (!%p2080_p3), 0  }
 0x871 LB: >> { %v1850_v52 = vld [vmem:[%s3225_s23] sm:$0xff]  ;;  %v1852_v39 = vld [vmem:[%s3225_s23 + $0x8] sm:$0xff]  ;;  %v1854_v40 = vld [vmem:[%s3225_s23 + $0x10] sm:$0xff]  ;;  %s1866_s26 = sadd.s32 1, %s3229_s27  ;;  %s1844_s24 = sadd.s32 1, %s3233_s24   ;;  %s3233_s24 = sphi %s3963_s24, %s1844_s24   ;;  %s3229_s27 = sphi %s3961_s27, %s4013_s27   ;;  %s3225_s23 = sphi %s4012_s23, %s1871_s23   ;;  %s3221_s17 = sphi %s4011_s17, %s1872_s17  }
 0x872   : >> { %1851 = vst [vmem:[%s3221_s17] sm:$0xff] %v1850_v52  ;;  %1853 = vst [vmem:[%s3221_s17 + $0x8] sm:$0xff] %v1852_v39  ;;  %v1856_v41 = vld [vmem:[%s3225_s23 + $0x18] sm:$0xff]  ;;  %v1858_v9 = vld [vmem:[%s3225_s23 + $0x20] sm:$0xff]  ;;  %p1867_p7 = scmp.ge.s32.totalorder %s1866_s26, %s3952_s22  ;;  %p1843_p8 = scmp.ge.s32.totalorder %s1844_s24, %s3952_s22 }
 0x873   : >> { %1855 = vst [vmem:[%s3221_s17 + $0x10] sm:$0xff] %v1854_v40  ;;  %v1860_v10 = vld [vmem:[%s3225_s23 + $0x28] sm:$0xff]  ;;  %1857 = vst [vmem:[%s3221_s17 + $0x18] sm:$0xff] %v1856_v41  ;;  %v1862_v11 = vld [vmem:[%s3225_s23 + $0x30] sm:$0xff] }
 0x874   : >> { %1859 = vst [vmem:[%s3221_s17 + $0x20] sm:$0xff] %v1858_v9  ;;  %1861 = vst [vmem:[%s3221_s17 + $0x28] sm:$0xff] %v1860_v10  ;;  %v1864_v16 = vld [vmem:[%s3225_s23 + $0x38] sm:$0xff]  ;;  %s4023_s26 = smov (%p1867_p7, %s1866_s26), 0  ;;  %1846 = sbr.rel (!%p1843_p8) target bundleno = 2161 (0x871), region = 144 }
 0x875   : >> { %1863 = vst [vmem:[%s3221_s17 + $0x30] sm:$0xff] %v1862_v11  ;;  %1865 = vst [vmem:[%s3221_s17 + $0x38] sm:$0xff] %v1864_v16  ;;  %s2081_s28 = sshll.u32 %s4023_s26, 6  ;;  %s4013_s27 = smov %s4023_s26 }
 0x876   : >> { %s1871_s23 = scalar_lea.vmem %s3330_s8, %s2081_s28 [#allocation3]   ;;  %s1872_s17 = scalar_lea.vmem %s3946_s15, %s2081_s28  }
 0x87b PF: > { %s3982_s29 = sand.u32 7, %s4021_s7   ;;  %s2092_s30 = sshll.u32 %s3952_s22, 6 }
 0x87c   : > { %s1877_s5 = scalar_lea.vmem %s3330_s8, %s2092_s30 [#allocation3]   ;;  %s1879_s6 = scalar_lea.vmem %s3946_s15, %s2092_s30  }
 0x87d   : > { %p2086_p9 = scmp.le.s32.totalorder %s3982_s29, 0 }
 0x87e   : > { %s3235_s9 = smov (!%p2086_p9), %s1879_s6   ;;  %s3239_s10 = smov (!%p2086_p9), %s1877_s5  }
 0x87f   : > { %1981 = sbr.rel (%p2086_p9) target bundleno = 2192 (0x890), region = 149  ;;  %s3243_s11 = smov (!%p2086_p9), 0  }
 0x880   : > { %s3247_s12 = smov (!%p2086_p9), 0  }
 0x886 LB: >> { %v1889_v17 = vld [vmem:[%s3241_s10] sm:$0xff]  ;;  %s1891_s7 = sadd.s32 1, %s3245_s11  ;;  %s1883_s12 = sadd.s32 1, %s3249_s12   ;;  %s3249_s12 = sphi %s3247_s12, %s1883_s12   ;;  %s3245_s11 = sphi %s3243_s11, %s3244_s11   ;;  %s3241_s10 = sphi %s3239_s10, %s1896_s10   ;;  %s3237_s9 = sphi %s3235_s9, %s1897_s9  }
 0x887   : >> { %1890 = vst [vmem:[%s3237_s9] sm:$0xff] %v1889_v17  ;;  %p1892_p10 = scmp.ge.s32.totalorder %s1891_s7, %s3982_s29  ;;  %p1882_p11 = scmp.ge.s32.totalorder %s1883_s12, %s3982_s29 }
 0x889   : >> { %s4025_s7 = smov (%p1892_p10, %s1891_s7), 0  ;;  %1885 = sbr.rel (!%p1882_p11) target bundleno = 2182 (0x886), region = 155 }
 0x88a   : >> { %s2087_s8 = sshll.u32 %s4025_s7, 3  ;;  %s3244_s11 = smov %s4025_s7  }
 0x88b   : >> { %s1896_s10 = scalar_lea.vmem %s1877_s5, %s2087_s8 [#allocation3]   ;;  %s1897_s9 = scalar_lea.vmem %s1879_s6, %s2087_s8  }
 0x890 PF: > { %s14_s19 = sadd.s32 1, %s3217_s19   ;;  %s4014_s15 = smov %s3205_s16 }
 0x891   : > { %p11_p12 = scmp.ge.s32.totalorder %s14_s19, 4   ;;  %s4015_s16 = smov %s3318_s25 }
 0x892   : > { %s4016_s17 = smov %s3213_s18  ;;  %s4017_s18 = smov %s4019_s21 }
 0x893   :  { %13 = sbr.rel (!%p11_p12) target bundleno = 3 (0x3), region = 166 }

</bundles_post_ra>
